<compile_context>
chip_gen: v5e
topology: v5e:2x2
jax: 0.10.0
libtpu: 0.0.40
codegen_flags: <defaults>
</compile_context>

<pallas_src>
import numpy as np
import jax
import jax.numpy as jnp
from jax import lax
from jax.experimental import pallas as pl
from jax.experimental.pallas import tpu as pltpu

# ------------------------- static configuration -------------------------
B = 2               # batch (number of agents)  -- attn-bias trick assumes B == 2
TOKEN_DIM = 16      # args.token_dim
EMB = 32            # args.emb
HEADS = 2           # args.heads
DEPTH = 2           # args.depth
FF = 4 * EMB        # ff_hidden_mult * emb = 128
PHASE_NUM = 4       # args.phase_num
PHASE_HIDDEN = 16   # args.phase_hidden
TAU = 1.0           # args.temperature
GUMBEL_HARD = False
DIVIDE_Q = True
PQMIX_V2 = False
N_ENEMY = 3
N_ALLY = 2
T_IN = 1 + N_ENEMY + N_ALLY     # entity tokens in `inputs`
T = T_IN + 1                    # +1 hidden-state token appended by Transformer2
BT = B * T                      # sublane-stacked slab height (14)
N_ACT = 6 + N_ENEMY             # q output width (9)
OUT_W = 128                     # lane-dense output slab width
NEG_INF = -1e30


def _layernorm(x, g, b):
    mu = jnp.mean(x, axis=-1, keepdims=True)
    var = jnp.mean((x - mu) ** 2, axis=-1, keepdims=True)
    return (x - mu) * lax.rsqrt(var + 1e-5) * g + b


# ----------------------------- fused kernel ------------------------------
def fused_kernel(inp_ref, hb_ref, pn_ref, we_ref, wqkv_ref, wu_ref,
                 wf1_ref, wf2_ref, vec_ref, sel_ref, wph_ref, wfc1_ref,
                 wfc2_ref, hpk_ref, out_ref):
    f32 = jnp.float32
    inv_scale = EMB ** -0.25

    # ---- token embedding + hidden/bias slab (no scratch, no misaligned stores)
    y = jnp.dot(inp_ref[...], we_ref[...], preferred_element_type=f32) + hb_ref[...]

    # ---- block-diagonal additive attention bias, computed in-kernel (B == 2)
    ra = jnp.where(lax.broadcasted_iota(jnp.int32, (BT, BT), 0) < T, 0.0, 1.0)
    ca = jnp.where(lax.broadcasted_iota(jnp.int32, (BT, BT), 1) < T, 0.0, 1.0)
    attn_bias = jnp.where(ra == ca, 0.0, NEG_INF)

    # --------------------------- transformer blocks ------------------------
    for d in range(DEPTH):                         # static -> unrolled
        vec = vec_ref[d]                           # (8, 128) per-depth vectors
        qkv = jnp.dot(y, wqkv_ref[d], preferred_element_type=f32)    # (BT, 192)
        heads = []
        for hh in range(HEADS):                    # static -> unrolled
            qh = qkv[:, hh * EMB:(hh + 1) * EMB] * inv_scale
            kh = qkv[:, (HEADS + hh) * EMB:(HEADS + hh + 1) * EMB] * inv_scale
            vh = qkv[:, (2 * HEADS + hh) * EMB:(2 * HEADS + hh + 1) * EMB]
            s = lax.dot_general(qh, kh, (((1,), (1,)), ((), ())),
                                preferred_element_type=f32) + attn_bias
            e = jnp.exp(s)        # scores O(1); masked (-1e30) entries exp -> 0
            att = e * pl.reciprocal(jnp.sum(e, axis=-1, keepdims=True), approx=True)
            heads.append(jnp.dot(att, vh, preferred_element_type=f32))
        ho = jnp.concatenate(heads, axis=-1)                          # (BT, 64)
        attended = jnp.dot(ho, wu_ref[d], preferred_element_type=f32) + vec[0:1, 0:EMB]
        x1 = _layernorm(attended + y, vec[1:2, 0:EMB], vec[2:3, 0:EMB])
        h1 = jnp.maximum(jnp.dot(x1, wf1_ref[d], preferred_element_type=f32)
                         + vec[6:7, :], 0.0)                          # (BT, FF)
        ffo = jnp.dot(h1, wf2_ref[d], preferred_element_type=f32) + vec[5:6, 0:EMB]
        y = _layernorm(ffo + x1, vec[3:4, 0:EMB], vec[4:5, 0:EMB])
        # dropout(p=0.0) is the identity

    # ---- select the (last, first) token rows per agent and apply toprobs ----
    wp_w = wph_ref[:, 0:EMB]                       # (EMB, EMB)  toprobs weight
    wqs_o = wph_ref[:, EMB:EMB + 6]                # (EMB, 6)    q_self obs weight
    bp = hpk_ref[0:1, 0:EMB]
    sel_y = jnp.dot(sel_ref[...], y, preferred_element_type=f32)      # (2B, EMB)
    out4 = jnp.dot(sel_y, wp_w, preferred_element_type=f32) + bp      # (2B, EMB)
    h2 = out4[0:B, :]                              # last-token (hidden) outputs
    self_out = out4[B:2 * B, :]                    # first-token outputs

    # ------------------ Gumbel skill head (the MLP: fc1/relu/fc2) ----------
    phase = pn_ref[:, 0:PHASE_NUM]
    noise = pn_ref[:, PHASE_NUM:2 * PHASE_NUM]
    z = jnp.concatenate([h2, phase], axis=-1)                         # (B, 36)
    hid1 = jnp.maximum(jnp.dot(z, wfc1_ref[...], preferred_element_type=f32)
                       + hpk_ref[1:2, 0:PHASE_HIDDEN], 0.0)
    logits = jnp.dot(hid1, wfc2_ref[...], preferred_element_type=f32) \
        + hpk_ref[2:3, 0:PHASE_NUM]
    g = (logits + noise) * (1.0 / TAU)
    g = g - jnp.max(g, axis=-1, keepdims=True)
    eg = jnp.exp(g)
    skill = eg * pl.reciprocal(jnp.sum(eg, axis=-1, keepdims=True), approx=True)
    # gumbel_hard=False -> the soft sample is the forward value

    # --------------------------- divided Q head ----------------------------
    bq7 = hpk_ref[3:4, 0:7]                        # [b_qself | folded b_qint]
    wq_int_t = hpk_ref[4:5, 0:EMB]                 # (1, EMB)  (wp @ wqi_obs).T
    wq_sk = hpk_ref[8:12, 0:7]                     # (PHASE_NUM, 7) skill halves
    s7 = jnp.dot(skill, wq_sk, preferred_element_type=f32)            # (B, 7)
    q_self = jnp.dot(self_out, wqs_o, preferred_element_type=f32) \
        + bq7[:, 0:6] + s7[:, 0:6]                                    # (B, 6)
    # interactive Q lane-major: one row, each agent's enemies are a lane slice
    qint_lane = lax.dot_general(wq_int_t, y, (((1,), (1,)), ((), ())),
                                preferred_element_type=f32)           # (1, BT)
    q_int = jnp.concatenate(
        [qint_lane[:, b * T + 1: b * T + 1 + N_ENEMY] for b in range(B)],
        axis=0) + bq7[:, 6:7] + s7[:, 6:7]                            # (B, 3)

    # ------------------- single lane-dense output slab ---------------------
    pad = jnp.zeros((B, OUT_W - (EMB + PHASE_NUM + N_ACT)), f32)
    out_ref[...] = jnp.concatenate([h2, skill, q_self, q_int, pad], axis=-1)


# --------------------------- wrapper / glue ------------------------------
def _full_spec(a):
    zeros = (0,) * a.ndim
    return pl.BlockSpec(a.shape, lambda i: zeros)


def prepare_kernel_params(p):
    """One-time parameter re-layout / packing for the fused kernel."""
    kp = {"we": p["we"], "be": p["be"], "wu": p["wu"],
          "wf1": p["wf1"], "wf2": p["wf2"],
          "w_fc1": p["w_fc1"], "wfc2": p["w_fc2"]}

    # fused per-layer projection weights: cols [q_h0 q_h1 | k_h0 k_h1 | v_h0 v_h1]
    kp["wqkv"] = jnp.concatenate([p["wq"], p["wk"], p["wv"]], axis=-1)  # (D,32,192)

    # per-depth small vectors packed into one (D, 8, 128) slab
    def row(v, w=FF):
        return jnp.pad(v, ((0, 0), (0, w - v.shape[1])))
    vecs = []
    for d in range(DEPTH):
        vecs.append(jnp.concatenate(
            [row(p["bu"][d]), row(p["g1"][d]), row(p["b1"][d]),
             row(p["g2"][d]), row(p["b2"][d]), row(p["bf2"][d]),
             row(p["bf1"][d]), jnp.zeros((1, FF), jnp.float32)], axis=0))
    kp["vecs"] = jnp.stack(vecs, axis=0)                                # (D, 8, 128)

    # row selectors: rows 0:B pick the last (hidden) token, rows B:2B the self token
    selm = np.zeros((2 * B, BT), np.float32)
    for b in range(B):
        selm[b, b * T + T - 1] = 1.0
        selm[B + b, b * T] = 1.0
    kp["sel"] = jnp.asarray(selm)

    # Q-head weight fusion + toprobs fold for the interactive part
    wqs_o = p["w_qself"][0:EMB, :]                 # (EMB, 6)
    wqs_s = p["w_qself"][EMB:, :]                  # (PN, 6)
    wqi_o = p["w_qint"][0:EMB, :]                  # (EMB, 1)
    wqi_s = p["w_qint"][EMB:, :]                   # (PN, 1)
    kp["wph"] = jnp.concatenate([p["wp"], wqs_o], axis=-1)              # (EMB, 38)
    wq_int_t = jnp.matmul(p["wp"], wqi_o).T                             # (1, EMB)
    b_int = jnp.matmul(p["bp"], wqi_o) + p["b_qint"]                    # (1, 1)
    bq7 = jnp.concatenate([p["b_qself"], b_int], axis=-1)               # (1, 7)
    wq_sk = jnp.concatenate([wqs_s, wqi_s], axis=-1)                    # (PN, 7)

    # head-parameter pack (16, 128)
    hpk = jnp.zeros((16, FF), jnp.float32)
    hpk = hpk.at[0:1].set(row(p["bp"]))
    hpk = hpk.at[1:2].set(row(p["b_fc1"]))
    hpk = hpk.at[2:3].set(row(p["b_fc2"]))
    hpk = hpk.at[3:4].set(row(bq7))
    hpk = hpk.at[4:5].set(row(wq_int_t))
    hpk = hpk.at[8:12].set(row(wq_sk))
    kp["hpk"] = hpk
    return kp


def run_fused(kp, inputs, hidden, phase, noise):
    inputs2 = inputs.reshape(B, T_IN, TOKEN_DIM)
    hidden2 = hidden.reshape(B, EMB)
    be = kp["be"]
    inp_rows, hb_rows = [], []
    for b in range(B):
        inp_rows += [inputs2[b], jnp.zeros((1, TOKEN_DIM), jnp.float32)]
        hb_rows += [jnp.broadcast_to(be, (T_IN, EMB)), hidden2[b:b + 1]]
    inp_slab = jnp.concatenate(inp_rows, axis=0)        # (BT, TOKEN_DIM), zero hidden rows
    hb_slab = jnp.concatenate(hb_rows, axis=0)          # (BT, EMB): be rows + hidden rows
    pn_slab = jnp.concatenate([phase.reshape(B, PHASE_NUM),
                               noise.reshape(B, PHASE_NUM)], axis=-1)   # (B, 8)

    args = [inp_slab, hb_slab, pn_slab,
            kp["we"], kp["wqkv"], kp["wu"], kp["wf1"], kp["wf2"], kp["vecs"],
            kp["sel"], kp["wph"], kp["w_fc1"], kp["wfc2"], kp["hpk"]]
    return pl.pallas_call(
        fused_kernel,
        out_shape=jax.ShapeDtypeStruct((B, OUT_W), jnp.float32),
        grid=(1,),
        in_specs=[_full_spec(a) for a in args],
        out_specs=pl.BlockSpec((B, OUT_W), lambda i: (0, 0)),
        compiler_params=pltpu.CompilerParams(dimension_semantics=("arbitrary",)),
    )(*args)


@jax.jit
def phase_updet2_forward(kp, inputs, hidden_state, phase_state, gumbel_noise):
    slab = run_fused(kp, inputs, hidden_state, phase_state, gumbel_noise)  # (B, 128)
    h = slab[:, :EMB].reshape(B, 1, EMB)
    skill = slab[:, EMB:EMB + PHASE_NUM]
    q = slab[:, EMB + PHASE_NUM:EMB + PHASE_NUM + N_ACT]
    dist_skill = jnp.eye(PHASE_NUM, dtype=skill.dtype)[jnp.argmax(skill, axis=-1)]
    if PQMIX_V2:
        p_indices = jnp.argmax(dist_skill, axis=-1) + 1
        return q, h, dist_skill, p_indices
    return q, h, dist_skill, skill


# ----------------------- pure-JAX reference (check) ----------------------
def reference_forward(p, inputs, hidden_state, phase_state, gumbel_noise):
    tok = jnp.matmul(inputs, p["we"]) + p["be"]
    y = jnp.concatenate([tok, hidden_state], axis=1)
    scale = EMB ** 0.25
    for d in range(DEPTH):
        k = jnp.matmul(y, p["wk"][d]).reshape(B, T, HEADS, EMB)
        q = jnp.matmul(y, p["wq"][d]).reshape(B, T, HEADS, EMB)
        v = jnp.matmul(y, p["wv"][d]).reshape(B, T, HEADS, EMB)
        q = jnp.transpose(q, (0, 2, 1, 3)) / scale
        k = jnp.transpose(k, (0, 2, 1, 3)) / scale
        v = jnp.transpose(v, (0, 2, 1, 3))
        att = jax.nn.softmax(jnp.einsum("bhqe,bhke->bhqk", q, k), -1)
        out = jnp.einsum("bhqk,bhke->bhqe", att, v)
        out = jnp.transpose(out, (0, 2, 1, 3)).reshape(B, T, HEADS * EMB)
        attended = jnp.matmul(out, p["wu"][d]) + p["bu"][d]
        x1 = _layernorm(attended + y, p["g1"][d], p["b1"][d])
        ff = jnp.matmul(jax.nn.relu(jnp.matmul(x1, p["wf1"][d]) + p["bf1"][d]),
                        p["wf2"][d]) + p["bf2"][d]
        y = _layernorm(ff + x1, p["g2"][d], p["b2"][d])
    outputs = jnp.matmul(y, p["wp"]) + p["bp"]
    h = outputs[:, -1:, :]
    z = jnp.concatenate([h, phase_state], axis=-1)
    hid1 = jax.nn.relu(jnp.matmul(z, p["w_fc1"]) + p["b_fc1"])
    logits = jnp.matmul(hid1, p["w_fc2"]) + p["b_fc2"]
    skill = jax.nn.softmax((logits + gumbel_noise[:, None, :]) / TAU, axis=-1)[:, 0, :]
    x0 = jnp.concatenate([outputs[:, 0, :], skill], axis=-1)
    q_basic = jnp.matmul(x0, p["w_qself"]) + p["b_qself"]
    qes = []
    for i in range(N_ENEMY):
        xi = jnp.concatenate([outputs[:, 1 + i, :], skill], axis=-1)
        if DIVIDE_Q:
            qes.append(jnp.matmul(xi, p["w_qint"]) + p["b_qint"])
        else:
            qes.append(jnp.mean(jnp.matmul(xi, p["w_qself"]) + p["b_qself"], 1,
                                keepdims=True))
    q = jnp.concatenate([q_basic] + qes, axis=1)
    dist_skill = jnp.eye(PHASE_NUM)[jnp.argmax(skill, axis=-1)]
    return q, h, dist_skill, skill


# ---------------------------- parameter init -----------------------------
def init_params(key):
    def linear(k, fan_in, fan_out, bias=True):
        k1, k2 = jax.random.split(k)
        bound = 1.0 / (fan_in ** 0.5)
        w = jax.random.uniform(k1, (fan_in, fan_out), jnp.float32, -bound, bound)
        if not bias:
            return w
        b = jax.random.uniform(k2, (1, fan_out), jnp.float32, -bound, bound)
        return w, b

    keys = iter(jax.random.split(key, 64))
    p = {}
    p["we"], p["be"] = linear(next(keys), TOKEN_DIM, EMB)
    wk, wq, wv, wu, bu, wf1, bf1, wf2, bf2 = ([] for _ in range(9))
    g1, b1, g2, b2 = ([] for _ in range(4))
    for _ in range(DEPTH):
        wk.append(linear(next(keys), EMB, EMB * HEADS, bias=False))
        wq.append(linear(next(keys), EMB, EMB * HEADS, bias=False))
        wv.append(linear(next(keys), EMB, EMB * HEADS, bias=False))
        w_u, b_u = linear(next(keys), EMB * HEADS, EMB); wu.append(w_u); bu.append(b_u)
        g1.append(jnp.ones((1, EMB), jnp.float32)); b1.append(jnp.zeros((1, EMB), jnp.float32))
        w1, bb1 = linear(next(keys), EMB, FF); wf1.append(w1); bf1.append(bb1)
        w2, bb2 = linear(next(keys), FF, EMB); wf2.append(w2); bf2.append(bb2)
        g2.append(jnp.ones((1, EMB), jnp.float32)); b2.append(jnp.zeros((1, EMB), jnp.float32))
    for name, lst in [("wk", wk), ("wq", wq), ("wv", wv), ("wu", wu), ("bu", bu),
                      ("g1", g1), ("b1", b1), ("wf1", wf1), ("bf1", bf1),
                      ("wf2", wf2), ("bf2", bf2), ("g2", g2), ("b2", b2)]:
        p[name] = jnp.stack(lst, axis=0)
    p["wp"], p["bp"] = linear(next(keys), EMB, EMB)                      # toprobs
    p["w_fc1"], p["b_fc1"] = linear(next(keys), EMB + PHASE_NUM, PHASE_HIDDEN)
    p["w_fc2"], p["b_fc2"] = linear(next(keys), PHASE_HIDDEN, PHASE_NUM)
    p["w_qself"], p["b_qself"] = linear(next(keys), EMB + PHASE_NUM, 6)
    p["w_qint"], p["b_qint"] = linear(next(keys), EMB + PHASE_NUM, 1)
    return p


# --------------------------------- main ----------------------------------
if __name__ == "__main__":
    key = jax.random.PRNGKey(0)
    k_p, kx, k_h, kg = jax.random.split(key, 4)
    params = init_params(k_p)
    kparams = prepare_kernel_params(params)

    inputs = jax.random.normal(kx, (B, T_IN, TOKEN_DIM), jnp.float32)
    hidden_state = 0.1 * jax.random.normal(k_h, (B, 1, EMB), jnp.float32)
    phase_state = jnp.zeros((B, 1, PHASE_NUM), jnp.float32).at[:, 0, 0].set(1.0)
    # TODO(synk): torch's F.gumbel_softmax draws noise with the torch RNG; we sample the
    # equivalent Gumbel(0,1) noise deterministically with jax.random and feed it in.
    gumbel_noise = jax.random.gumbel(kg, (B, PHASE_NUM), jnp.float32)

    q, h, dist_skill, skill = jax.block_until_ready(
        phase_updet2_forward(kparams, inputs, hidden_state, phase_state, gumbel_noise))

    q_r, h_r, dist_r, skill_r = reference_forward(
        params, inputs, hidden_state, phase_state, gumbel_noise)

    assert q.shape == (B, N_ACT) and h.shape == (B, 1, EMB)
    assert dist_skill.shape == (B, PHASE_NUM) and skill.shape == (B, PHASE_NUM)
    assert jnp.allclose(q, q_r, atol=2e-2, rtol=2e-2)
    assert jnp.allclose(h, h_r, atol=2e-2, rtol=2e-2)
    assert jnp.allclose(skill, skill_r, atol=2e-2, rtol=2e-2)
    print("KERNEL_OK")
</pallas_src>

<mosaic_0001>
module attributes {stable_mosaic.version = 11 : i64} {
  func.func @fused_kernel(%arg0: i32, %arg1: memref<14x16xf32, #tpu.memory_space<vmem>>, %arg2: memref<14x32xf32, #tpu.memory_space<vmem>>, %arg3: memref<2x8xf32, #tpu.memory_space<vmem>>, %arg4: memref<16x32xf32, #tpu.memory_space<vmem>>, %arg5: memref<2x32x192xf32, #tpu.memory_space<vmem>>, %arg6: memref<2x64x32xf32, #tpu.memory_space<vmem>>, %arg7: memref<2x32x128xf32, #tpu.memory_space<vmem>>, %arg8: memref<2x128x32xf32, #tpu.memory_space<vmem>>, %arg9: memref<2x8x128xf32, #tpu.memory_space<vmem>>, %arg10: memref<4x14xf32, #tpu.memory_space<vmem>>, %arg11: memref<32x38xf32, #tpu.memory_space<vmem>>, %arg12: memref<36x16xf32, #tpu.memory_space<vmem>>, %arg13: memref<16x4xf32, #tpu.memory_space<vmem>>, %arg14: memref<16x128xf32, #tpu.memory_space<vmem>>, %arg15: memref<2x128xf32, #tpu.memory_space<vmem>>) attributes {dimension_semantics = [#tpu.dimension_semantics<arbitrary>], iteration_bounds = array<i64: 1>, scalar_prefetch = 0 : i64, scratch_operands = 0 : i64, tpu.core_type = #tpu.core_type<tc>, window_params = [{pipeline_mode = #tpu.pipeline_mode<synchronous>, transform_indices = @transform_0, window_bounds = array<i64: 14, 16>}, {pipeline_mode = #tpu.pipeline_mode<synchronous>, transform_indices = @transform_1, window_bounds = array<i64: 14, 32>}, {pipeline_mode = #tpu.pipeline_mode<synchronous>, transform_indices = @transform_2, window_bounds = array<i64: 2, 8>}, {pipeline_mode = #tpu.pipeline_mode<synchronous>, transform_indices = @transform_3, window_bounds = array<i64: 16, 32>}, {pipeline_mode = #tpu.pipeline_mode<synchronous>, transform_indices = @transform_4, window_bounds = array<i64: 2, 32, 192>}, {pipeline_mode = #tpu.pipeline_mode<synchronous>, transform_indices = @transform_5, window_bounds = array<i64: 2, 64, 32>}, {pipeline_mode = #tpu.pipeline_mode<synchronous>, transform_indices = @transform_6, window_bounds = array<i64: 2, 32, 128>}, {pipeline_mode = #tpu.pipeline_mode<synchronous>, transform_indices = @transform_7, window_bounds = array<i64: 2, 128, 32>}, {pipeline_mode = #tpu.pipeline_mode<synchronous>, transform_indices = @transform_8, window_bounds = array<i64: 2, 8, 128>}, {pipeline_mode = #tpu.pipeline_mode<synchronous>, transform_indices = @transform_9, window_bounds = array<i64: 4, 14>}, {pipeline_mode = #tpu.pipeline_mode<synchronous>, transform_indices = @transform_10, window_bounds = array<i64: 32, 38>}, {pipeline_mode = #tpu.pipeline_mode<synchronous>, transform_indices = @transform_11, window_bounds = array<i64: 36, 16>}, {pipeline_mode = #tpu.pipeline_mode<synchronous>, transform_indices = @transform_12, window_bounds = array<i64: 16, 4>}, {pipeline_mode = #tpu.pipeline_mode<synchronous>, transform_indices = @transform_13, window_bounds = array<i64: 16, 128>}, {pipeline_mode = #tpu.pipeline_mode<synchronous>, transform_indices = @transform_14, window_bounds = array<i64: 2, 128>}]} {
    %c0 = arith.constant 0 : index
    %c0_0 = arith.constant 0 : index
    %0 = vector.load %arg1[%c0, %c0_0] : memref<14x16xf32, #tpu.memory_space<vmem>>, vector<14x16xf32>
    %c0_1 = arith.constant 0 : index
    %c0_2 = arith.constant 0 : index
    %1 = vector.load %arg4[%c0_1, %c0_2] : memref<16x32xf32, #tpu.memory_space<vmem>>, vector<16x32xf32>
    %cst = arith.constant dense<0.000000e+00> : vector<14x32xf32>
    %2 = tpu.matmul %0, %1, %cst {dimension_numbers = #tpu.dot_dimension_numbers<[1], [0], [0], [1], [0, 0, 1, 1], [], []>} : vector<14x16xf32>, vector<16x32xf32>, vector<14x32xf32> -> vector<14x32xf32>
    %c0_3 = arith.constant 0 : index
    %c0_4 = arith.constant 0 : index
    %3 = vector.load %arg2[%c0_3, %c0_4] : memref<14x32xf32, #tpu.memory_space<vmem>>, vector<14x32xf32>
    %4 = arith.addf %2, %3 : vector<14x32xf32>
    %5 = tpu.iota {dimensions = array<i32: 0>} : vector<14x14xi32>
    %c7_i32 = arith.constant 7 : i32
    %6 = vector.broadcast %c7_i32 : i32 to vector<14x14xi32>
    %7 = arith.cmpi slt, %5, %6 : vector<14x14xi32>
    %cst_5 = arith.constant 0.000000e+00 : f32
    %cst_6 = arith.constant 1.000000e+00 : f32
    %8 = vector.broadcast %cst_5 : f32 to vector<14x14xf32>
    %9 = vector.broadcast %cst_6 : f32 to vector<14x14xf32>
    %10 = arith.select %7, %8, %9 : vector<14x14xi1>, vector<14x14xf32>
    %11 = tpu.iota {dimensions = array<i32: 1>} : vector<14x14xi32>
    %c7_i32_7 = arith.constant 7 : i32
    %12 = vector.broadcast %c7_i32_7 : i32 to vector<14x14xi32>
    %13 = arith.cmpi slt, %11, %12 : vector<14x14xi32>
    %cst_8 = arith.constant 0.000000e+00 : f32
    %cst_9 = arith.constant 1.000000e+00 : f32
    %14 = vector.broadcast %cst_8 : f32 to vector<14x14xf32>
    %15 = vector.broadcast %cst_9 : f32 to vector<14x14xf32>
    %16 = arith.select %13, %14, %15 : vector<14x14xi1>, vector<14x14xf32>
    %17 = arith.cmpf oeq, %10, %16 : vector<14x14xf32>
    %cst_10 = arith.constant 0.000000e+00 : f32
    %cst_11 = arith.constant -1.000000e+30 : f32
    %18 = vector.broadcast %cst_10 : f32 to vector<14x14xf32>
    %19 = vector.broadcast %cst_11 : f32 to vector<14x14xf32>
    %20 = arith.select %17, %18, %19 : vector<14x14xi1>, vector<14x14xf32>
    %c0_12 = arith.constant 0 : index
    %c0_13 = arith.constant 0 : index
    %c0_14 = arith.constant 0 : index
    %21 = vector.load %arg9[%c0_12, %c0_13, %c0_14] : memref<2x8x128xf32, #tpu.memory_space<vmem>>, vector<1x8x128xf32>
    %22 = vector.shape_cast %21 : vector<1x8x128xf32> to vector<8x128xf32>
    %c0_15 = arith.constant 0 : index
    %c0_16 = arith.constant 0 : index
    %c0_17 = arith.constant 0 : index
    %23 = vector.load %arg5[%c0_15, %c0_16, %c0_17] : memref<2x32x192xf32, #tpu.memory_space<vmem>>, vector<1x32x192xf32>
    %24 = vector.shape_cast %23 : vector<1x32x192xf32> to vector<32x192xf32>
    %cst_18 = arith.constant dense<0.000000e+00> : vector<14x192xf32>
    %25 = tpu.matmul %4, %24, %cst_18 {dimension_numbers = #tpu.dot_dimension_numbers<[1], [0], [0], [1], [0, 0, 1, 1], [], []>} : vector<14x32xf32>, vector<32x192xf32>, vector<14x192xf32> -> vector<14x192xf32>
    %26 = vector.extract_strided_slice %25 {offsets = [0, 0], sizes = [14, 32], strides = [1, 1]} : vector<14x192xf32> to vector<14x32xf32>
    %cst_19 = arith.constant 0.420448214 : f32
    %27 = vector.broadcast %cst_19 : f32 to vector<14x32xf32>
    %28 = arith.mulf %26, %27 : vector<14x32xf32>
    %29 = vector.extract_strided_slice %25 {offsets = [0, 64], sizes = [14, 32], strides = [1, 1]} : vector<14x192xf32> to vector<14x32xf32>
    %cst_20 = arith.constant 0.420448214 : f32
    %30 = vector.broadcast %cst_20 : f32 to vector<14x32xf32>
    %31 = arith.mulf %29, %30 : vector<14x32xf32>
    %32 = vector.extract_strided_slice %25 {offsets = [0, 128], sizes = [14, 32], strides = [1, 1]} : vector<14x192xf32> to vector<14x32xf32>
    %cst_21 = arith.constant dense<0.000000e+00> : vector<14x14xf32>
    %33 = tpu.matmul %28, %31, %cst_21 {dimension_numbers = #tpu.dot_dimension_numbers<[1], [1], [0], [0], [0, 0, 1, 0], [], []>} : vector<14x32xf32>, vector<14x32xf32>, vector<14x14xf32> -> vector<14x14xf32>
    %34 = arith.addf %33, %20 : vector<14x14xf32>
    %35 = math.exp %34 : vector<14x14xf32>
    %cst_22 = arith.constant dense<0.000000e+00> : vector<14xf32>
    %36 = vector.multi_reduction <add>, %35, %cst_22 [1] : vector<14x14xf32> to vector<14xf32>
    %37 = vector.shape_cast %36 : vector<14xf32> to vector<14x1xf32>
    %38 = tpu.reciprocal %37 {approx = true} : vector<14x1xf32> -> vector<14x1xf32>
    %39 = vector.broadcast %38 : vector<14x1xf32> to vector<14x14xf32>
    %40 = arith.mulf %35, %39 : vector<14x14xf32>
    %cst_23 = arith.constant dense<0.000000e+00> : vector<14x32xf32>
    %41 = tpu.matmul %40, %32, %cst_23 {dimension_numbers = #tpu.dot_dimension_numbers<[1], [0], [0], [1], [0, 0, 1, 1], [], []>} : vector<14x14xf32>, vector<14x32xf32>, vector<14x32xf32> -> vector<14x32xf32>
    %42 = vector.extract_strided_slice %25 {offsets = [0, 32], sizes = [14, 32], strides = [1, 1]} : vector<14x192xf32> to vector<14x32xf32>
    %cst_24 = arith.constant 0.420448214 : f32
    %43 = vector.broadcast %cst_24 : f32 to vector<14x32xf32>
    %44 = arith.mulf %42, %43 : vector<14x32xf32>
    %45 = vector.extract_strided_slice %25 {offsets = [0, 96], sizes = [14, 32], strides = [1, 1]} : vector<14x192xf32> to vector<14x32xf32>
    %cst_25 = arith.constant 0.420448214 : f32
    %46 = vector.broadcast %cst_25 : f32 to vector<14x32xf32>
    %47 = arith.mulf %45, %46 : vector<14x32xf32>
    %48 = vector.extract_strided_slice %25 {offsets = [0, 160], sizes = [14, 32], strides = [1, 1]} : vector<14x192xf32> to vector<14x32xf32>
    %cst_26 = arith.constant dense<0.000000e+00> : vector<14x14xf32>
    %49 = tpu.matmul %44, %47, %cst_26 {dimension_numbers = #tpu.dot_dimension_numbers<[1], [1], [0], [0], [0, 0, 1, 0], [], []>} : vector<14x32xf32>, vector<14x32xf32>, vector<14x14xf32> -> vector<14x14xf32>
    %50 = arith.addf %49, %20 : vector<14x14xf32>
    %51 = math.exp %50 : vector<14x14xf32>
    %cst_27 = arith.constant dense<0.000000e+00> : vector<14xf32>
    %52 = vector.multi_reduction <add>, %51, %cst_27 [1] : vector<14x14xf32> to vector<14xf32>
    %53 = vector.shape_cast %52 : vector<14xf32> to vector<14x1xf32>
    %54 = tpu.reciprocal %53 {approx = true} : vector<14x1xf32> -> vector<14x1xf32>
    %55 = vector.broadcast %54 : vector<14x1xf32> to vector<14x14xf32>
    %56 = arith.mulf %51, %55 : vector<14x14xf32>
    %cst_28 = arith.constant dense<0.000000e+00> : vector<14x32xf32>
    %57 = tpu.matmul %56, %48, %cst_28 {dimension_numbers = #tpu.dot_dimension_numbers<[1], [0], [0], [1], [0, 0, 1, 1], [], []>} : vector<14x14xf32>, vector<14x32xf32>, vector<14x32xf32> -> vector<14x32xf32>
    %58 = tpu.concatenate %41, %57 in 1 : vector<14x32xf32>, vector<14x32xf32> -> vector<14x64xf32>
    %c0_29 = arith.constant 0 : index
    %c0_30 = arith.constant 0 : index
    %c0_31 = arith.constant 0 : index
    %59 = vector.load %arg6[%c0_29, %c0_30, %c0_31] : memref<2x64x32xf32, #tpu.memory_space<vmem>>, vector<1x64x32xf32>
    %60 = vector.shape_cast %59 : vector<1x64x32xf32> to vector<64x32xf32>
    %cst_32 = arith.constant dense<0.000000e+00> : vector<14x32xf32>
    %61 = tpu.matmul %58, %60, %cst_32 {dimension_numbers = #tpu.dot_dimension_numbers<[1], [0], [0], [1], [0, 0, 1, 1], [], []>} : vector<14x64xf32>, vector<64x32xf32>, vector<14x32xf32> -> vector<14x32xf32>
    %62 = vector.extract_strided_slice %22 {offsets = [0, 0], sizes = [1, 32], strides = [1, 1]} : vector<8x128xf32> to vector<1x32xf32>
    %63 = vector.broadcast %62 : vector<1x32xf32> to vector<14x32xf32>
    %64 = arith.addf %61, %63 : vector<14x32xf32>
    %65 = arith.addf %64, %4 : vector<14x32xf32>
    %66 = vector.extract_strided_slice %22 {offsets = [1, 0], sizes = [1, 32], strides = [1, 1]} : vector<8x128xf32> to vector<1x32xf32>
    %67 = vector.extract_strided_slice %22 {offsets = [2, 0], sizes = [1, 32], strides = [1, 1]} : vector<8x128xf32> to vector<1x32xf32>
    %cst_33 = arith.constant dense<0.000000e+00> : vector<14xf32>
    %68 = vector.multi_reduction <add>, %65, %cst_33 [1] : vector<14x32xf32> to vector<14xf32>
    %69 = vector.shape_cast %68 : vector<14xf32> to vector<14x1xf32>
    %cst_34 = arith.constant 3.200000e+01 : f32
    %70 = vector.broadcast %cst_34 : f32 to vector<14x1xf32>
    %71 = arith.divf %69, %70 : vector<14x1xf32>
    %72 = vector.broadcast %71 : vector<14x1xf32> to vector<14x32xf32>
    %73 = arith.subf %65, %72 : vector<14x32xf32>
    %74 = arith.mulf %73, %73 : vector<14x32xf32>
    %cst_35 = arith.constant dense<0.000000e+00> : vector<14xf32>
    %75 = vector.multi_reduction <add>, %74, %cst_35 [1] : vector<14x32xf32> to vector<14xf32>
    %76 = vector.shape_cast %75 : vector<14xf32> to vector<14x1xf32>
    %cst_36 = arith.constant 3.200000e+01 : f32
    %77 = vector.broadcast %cst_36 : f32 to vector<14x1xf32>
    %78 = arith.divf %76, %77 : vector<14x1xf32>
    %79 = vector.broadcast %71 : vector<14x1xf32> to vector<14x32xf32>
    %80 = arith.subf %65, %79 : vector<14x32xf32>
    %cst_37 = arith.constant 9.99999974E-6 : f32
    %81 = vector.broadcast %cst_37 : f32 to vector<14x1xf32>
    %82 = arith.addf %78, %81 : vector<14x1xf32>
    %83 = math.rsqrt %82 : vector<14x1xf32>
    %84 = vector.broadcast %83 : vector<14x1xf32> to vector<14x32xf32>
    %85 = arith.mulf %80, %84 : vector<14x32xf32>
    %86 = vector.broadcast %66 : vector<1x32xf32> to vector<14x32xf32>
    %87 = arith.mulf %85, %86 : vector<14x32xf32>
    %88 = vector.broadcast %67 : vector<1x32xf32> to vector<14x32xf32>
    %89 = arith.addf %87, %88 : vector<14x32xf32>
    %c0_38 = arith.constant 0 : index
    %c0_39 = arith.constant 0 : index
    %c0_40 = arith.constant 0 : index
    %90 = vector.load %arg7[%c0_38, %c0_39, %c0_40] : memref<2x32x128xf32, #tpu.memory_space<vmem>>, vector<1x32x128xf32>
    %91 = vector.shape_cast %90 : vector<1x32x128xf32> to vector<32x128xf32>
    %cst_41 = arith.constant dense<0.000000e+00> : vector<14x128xf32>
    %92 = tpu.matmul %89, %91, %cst_41 {dimension_numbers = #tpu.dot_dimension_numbers<[1], [0], [0], [1], [0, 0, 1, 1], [], []>} : vector<14x32xf32>, vector<32x128xf32>, vector<14x128xf32> -> vector<14x128xf32>
    %93 = vector.extract_strided_slice %22 {offsets = [6, 0], sizes = [1, 128], strides = [1, 1]} : vector<8x128xf32> to vector<1x128xf32>
    %94 = vector.broadcast %93 : vector<1x128xf32> to vector<14x128xf32>
    %95 = arith.addf %92, %94 : vector<14x128xf32>
    %cst_42 = arith.constant 0.000000e+00 : f32
    %96 = vector.broadcast %cst_42 : f32 to vector<14x128xf32>
    %97 = arith.maximumf %95, %96 : vector<14x128xf32>
    %c0_43 = arith.constant 0 : index
    %c0_44 = arith.constant 0 : index
    %c0_45 = arith.constant 0 : index
    %98 = vector.load %arg8[%c0_43, %c0_44, %c0_45] : memref<2x128x32xf32, #tpu.memory_space<vmem>>, vector<1x128x32xf32>
    %99 = vector.shape_cast %98 : vector<1x128x32xf32> to vector<128x32xf32>
    %cst_46 = arith.constant dense<0.000000e+00> : vector<14x32xf32>
    %100 = tpu.matmul %97, %99, %cst_46 {dimension_numbers = #tpu.dot_dimension_numbers<[1], [0], [0], [1], [0, 0, 1, 1], [], []>} : vector<14x128xf32>, vector<128x32xf32>, vector<14x32xf32> -> vector<14x32xf32>
    %101 = vector.extract_strided_slice %22 {offsets = [5, 0], sizes = [1, 32], strides = [1, 1]} : vector<8x128xf32> to vector<1x32xf32>
    %102 = vector.broadcast %101 : vector<1x32xf32> to vector<14x32xf32>
    %103 = arith.addf %100, %102 : vector<14x32xf32>
    %104 = arith.addf %103, %89 : vector<14x32xf32>
    %105 = vector.extract_strided_slice %22 {offsets = [3, 0], sizes = [1, 32], strides = [1, 1]} : vector<8x128xf32> to vector<1x32xf32>
    %106 = vector.extract_strided_slice %22 {offsets = [4, 0], sizes = [1, 32], strides = [1, 1]} : vector<8x128xf32> to vector<1x32xf32>
    %cst_47 = arith.constant dense<0.000000e+00> : vector<14xf32>
    %107 = vector.multi_reduction <add>, %104, %cst_47 [1] : vector<14x32xf32> to vector<14xf32>
    %108 = vector.shape_cast %107 : vector<14xf32> to vector<14x1xf32>
    %cst_48 = arith.constant 3.200000e+01 : f32
    %109 = vector.broadcast %cst_48 : f32 to vector<14x1xf32>
    %110 = arith.divf %108, %109 : vector<14x1xf32>
    %111 = vector.broadcast %110 : vector<14x1xf32> to vector<14x32xf32>
    %112 = arith.subf %104, %111 : vector<14x32xf32>
    %113 = arith.mulf %112, %112 : vector<14x32xf32>
    %cst_49 = arith.constant dense<0.000000e+00> : vector<14xf32>
    %114 = vector.multi_reduction <add>, %113, %cst_49 [1] : vector<14x32xf32> to vector<14xf32>
    %115 = vector.shape_cast %114 : vector<14xf32> to vector<14x1xf32>
    %cst_50 = arith.constant 3.200000e+01 : f32
    %116 = vector.broadcast %cst_50 : f32 to vector<14x1xf32>
    %117 = arith.divf %115, %116 : vector<14x1xf32>
    %118 = vector.broadcast %110 : vector<14x1xf32> to vector<14x32xf32>
    %119 = arith.subf %104, %118 : vector<14x32xf32>
    %cst_51 = arith.constant 9.99999974E-6 : f32
    %120 = vector.broadcast %cst_51 : f32 to vector<14x1xf32>
    %121 = arith.addf %117, %120 : vector<14x1xf32>
    %122 = math.rsqrt %121 : vector<14x1xf32>
    %123 = vector.broadcast %122 : vector<14x1xf32> to vector<14x32xf32>
    %124 = arith.mulf %119, %123 : vector<14x32xf32>
    %125 = vector.broadcast %105 : vector<1x32xf32> to vector<14x32xf32>
    %126 = arith.mulf %124, %125 : vector<14x32xf32>
    %127 = vector.broadcast %106 : vector<1x32xf32> to vector<14x32xf32>
    %128 = arith.addf %126, %127 : vector<14x32xf32>
    %c1 = arith.constant 1 : index
    %c0_52 = arith.constant 0 : index
    %c0_53 = arith.constant 0 : index
    %129 = vector.load %arg9[%c1, %c0_52, %c0_53] : memref<2x8x128xf32, #tpu.memory_space<vmem>>, vector<1x8x128xf32>
    %130 = vector.shape_cast %129 : vector<1x8x128xf32> to vector<8x128xf32>
    %c1_54 = arith.constant 1 : index
    %c0_55 = arith.constant 0 : index
    %c0_56 = arith.constant 0 : index
    %131 = vector.load %arg5[%c1_54, %c0_55, %c0_56] : memref<2x32x192xf32, #tpu.memory_space<vmem>>, vector<1x32x192xf32>
    %132 = vector.shape_cast %131 : vector<1x32x192xf32> to vector<32x192xf32>
    %cst_57 = arith.constant dense<0.000000e+00> : vector<14x192xf32>
    %133 = tpu.matmul %128, %132, %cst_57 {dimension_numbers = #tpu.dot_dimension_numbers<[1], [0], [0], [1], [0, 0, 1, 1], [], []>} : vector<14x32xf32>, vector<32x192xf32>, vector<14x192xf32> -> vector<14x192xf32>
    %134 = vector.extract_strided_slice %133 {offsets = [0, 0], sizes = [14, 32], strides = [1, 1]} : vector<14x192xf32> to vector<14x32xf32>
    %cst_58 = arith.constant 0.420448214 : f32
    %135 = vector.broadcast %cst_58 : f32 to vector<14x32xf32>
    %136 = arith.mulf %134, %135 : vector<14x32xf32>
    %137 = vector.extract_strided_slice %133 {offsets = [0, 64], sizes = [14, 32], strides = [1, 1]} : vector<14x192xf32> to vector<14x32xf32>
    %cst_59 = arith.constant 0.420448214 : f32
    %138 = vector.broadcast %cst_59 : f32 to vector<14x32xf32>
    %139 = arith.mulf %137, %138 : vector<14x32xf32>
    %140 = vector.extract_strided_slice %133 {offsets = [0, 128], sizes = [14, 32], strides = [1, 1]} : vector<14x192xf32> to vector<14x32xf32>
    %cst_60 = arith.constant dense<0.000000e+00> : vector<14x14xf32>
    %141 = tpu.matmul %136, %139, %cst_60 {dimension_numbers = #tpu.dot_dimension_numbers<[1], [1], [0], [0], [0, 0, 1, 0], [], []>} : vector<14x32xf32>, vector<14x32xf32>, vector<14x14xf32> -> vector<14x14xf32>
    %142 = arith.addf %141, %20 : vector<14x14xf32>
    %143 = math.exp %142 : vector<14x14xf32>
    %cst_61 = arith.constant dense<0.000000e+00> : vector<14xf32>
    %144 = vector.multi_reduction <add>, %143, %cst_61 [1] : vector<14x14xf32> to vector<14xf32>
    %145 = vector.shape_cast %144 : vector<14xf32> to vector<14x1xf32>
    %146 = tpu.reciprocal %145 {approx = true} : vector<14x1xf32> -> vector<14x1xf32>
    %147 = vector.broadcast %146 : vector<14x1xf32> to vector<14x14xf32>
    %148 = arith.mulf %143, %147 : vector<14x14xf32>
    %cst_62 = arith.constant dense<0.000000e+00> : vector<14x32xf32>
    %149 = tpu.matmul %148, %140, %cst_62 {dimension_numbers = #tpu.dot_dimension_numbers<[1], [0], [0], [1], [0, 0, 1, 1], [], []>} : vector<14x14xf32>, vector<14x32xf32>, vector<14x32xf32> -> vector<14x32xf32>
    %150 = vector.extract_strided_slice %133 {offsets = [0, 32], sizes = [14, 32], strides = [1, 1]} : vector<14x192xf32> to vector<14x32xf32>
    %cst_63 = arith.constant 0.420448214 : f32
    %151 = vector.broadcast %cst_63 : f32 to vector<14x32xf32>
    %152 = arith.mulf %150, %151 : vector<14x32xf32>
    %153 = vector.extract_strided_slice %133 {offsets = [0, 96], sizes = [14, 32], strides = [1, 1]} : vector<14x192xf32> to vector<14x32xf32>
    %cst_64 = arith.constant 0.420448214 : f32
    %154 = vector.broadcast %cst_64 : f32 to vector<14x32xf32>
    %155 = arith.mulf %153, %154 : vector<14x32xf32>
    %156 = vector.extract_strided_slice %133 {offsets = [0, 160], sizes = [14, 32], strides = [1, 1]} : vector<14x192xf32> to vector<14x32xf32>
    %cst_65 = arith.constant dense<0.000000e+00> : vector<14x14xf32>
    %157 = tpu.matmul %152, %155, %cst_65 {dimension_numbers = #tpu.dot_dimension_numbers<[1], [1], [0], [0], [0, 0, 1, 0], [], []>} : vector<14x32xf32>, vector<14x32xf32>, vector<14x14xf32> -> vector<14x14xf32>
    %158 = arith.addf %157, %20 : vector<14x14xf32>
    %159 = math.exp %158 : vector<14x14xf32>
    %cst_66 = arith.constant dense<0.000000e+00> : vector<14xf32>
    %160 = vector.multi_reduction <add>, %159, %cst_66 [1] : vector<14x14xf32> to vector<14xf32>
    %161 = vector.shape_cast %160 : vector<14xf32> to vector<14x1xf32>
    %162 = tpu.reciprocal %161 {approx = true} : vector<14x1xf32> -> vector<14x1xf32>
    %163 = vector.broadcast %162 : vector<14x1xf32> to vector<14x14xf32>
    %164 = arith.mulf %159, %163 : vector<14x14xf32>
    %cst_67 = arith.constant dense<0.000000e+00> : vector<14x32xf32>
    %165 = tpu.matmul %164, %156, %cst_67 {dimension_numbers = #tpu.dot_dimension_numbers<[1], [0], [0], [1], [0, 0, 1, 1], [], []>} : vector<14x14xf32>, vector<14x32xf32>, vector<14x32xf32> -> vector<14x32xf32>
    %166 = tpu.concatenate %149, %165 in 1 : vector<14x32xf32>, vector<14x32xf32> -> vector<14x64xf32>
    %c1_68 = arith.constant 1 : index
    %c0_69 = arith.constant 0 : index
    %c0_70 = arith.constant 0 : index
    %167 = vector.load %arg6[%c1_68, %c0_69, %c0_70] : memref<2x64x32xf32, #tpu.memory_space<vmem>>, vector<1x64x32xf32>
    %168 = vector.shape_cast %167 : vector<1x64x32xf32> to vector<64x32xf32>
    %cst_71 = arith.constant dense<0.000000e+00> : vector<14x32xf32>
    %169 = tpu.matmul %166, %168, %cst_71 {dimension_numbers = #tpu.dot_dimension_numbers<[1], [0], [0], [1], [0, 0, 1, 1], [], []>} : vector<14x64xf32>, vector<64x32xf32>, vector<14x32xf32> -> vector<14x32xf32>
    %170 = vector.extract_strided_slice %130 {offsets = [0, 0], sizes = [1, 32], strides = [1, 1]} : vector<8x128xf32> to vector<1x32xf32>
    %171 = vector.broadcast %170 : vector<1x32xf32> to vector<14x32xf32>
    %172 = arith.addf %169, %171 : vector<14x32xf32>
    %173 = arith.addf %172, %128 : vector<14x32xf32>
    %174 = vector.extract_strided_slice %130 {offsets = [1, 0], sizes = [1, 32], strides = [1, 1]} : vector<8x128xf32> to vector<1x32xf32>
    %175 = vector.extract_strided_slice %130 {offsets = [2, 0], sizes = [1, 32], strides = [1, 1]} : vector<8x128xf32> to vector<1x32xf32>
    %cst_72 = arith.constant dense<0.000000e+00> : vector<14xf32>
    %176 = vector.multi_reduction <add>, %173, %cst_72 [1] : vector<14x32xf32> to vector<14xf32>
    %177 = vector.shape_cast %176 : vector<14xf32> to vector<14x1xf32>
    %cst_73 = arith.constant 3.200000e+01 : f32
    %178 = vector.broadcast %cst_73 : f32 to vector<14x1xf32>
    %179 = arith.divf %177, %178 : vector<14x1xf32>
    %180 = vector.broadcast %179 : vector<14x1xf32> to vector<14x32xf32>
    %181 = arith.subf %173, %180 : vector<14x32xf32>
    %182 = arith.mulf %181, %181 : vector<14x32xf32>
    %cst_74 = arith.constant dense<0.000000e+00> : vector<14xf32>
    %183 = vector.multi_reduction <add>, %182, %cst_74 [1] : vector<14x32xf32> to vector<14xf32>
    %184 = vector.shape_cast %183 : vector<14xf32> to vector<14x1xf32>
    %cst_75 = arith.constant 3.200000e+01 : f32
    %185 = vector.broadcast %cst_75 : f32 to vector<14x1xf32>
    %186 = arith.divf %184, %185 : vector<14x1xf32>
    %187 = vector.broadcast %179 : vector<14x1xf32> to vector<14x32xf32>
    %188 = arith.subf %173, %187 : vector<14x32xf32>
    %cst_76 = arith.constant 9.99999974E-6 : f32
    %189 = vector.broadcast %cst_76 : f32 to vector<14x1xf32>
    %190 = arith.addf %186, %189 : vector<14x1xf32>
    %191 = math.rsqrt %190 : vector<14x1xf32>
    %192 = vector.broadcast %191 : vector<14x1xf32> to vector<14x32xf32>
    %193 = arith.mulf %188, %192 : vector<14x32xf32>
    %194 = vector.broadcast %174 : vector<1x32xf32> to vector<14x32xf32>
    %195 = arith.mulf %193, %194 : vector<14x32xf32>
    %196 = vector.broadcast %175 : vector<1x32xf32> to vector<14x32xf32>
    %197 = arith.addf %195, %196 : vector<14x32xf32>
    %c1_77 = arith.constant 1 : index
    %c0_78 = arith.constant 0 : index
    %c0_79 = arith.constant 0 : index
    %198 = vector.load %arg7[%c1_77, %c0_78, %c0_79] : memref<2x32x128xf32, #tpu.memory_space<vmem>>, vector<1x32x128xf32>
    %199 = vector.shape_cast %198 : vector<1x32x128xf32> to vector<32x128xf32>
    %cst_80 = arith.constant dense<0.000000e+00> : vector<14x128xf32>
    %200 = tpu.matmul %197, %199, %cst_80 {dimension_numbers = #tpu.dot_dimension_numbers<[1], [0], [0], [1], [0, 0, 1, 1], [], []>} : vector<14x32xf32>, vector<32x128xf32>, vector<14x128xf32> -> vector<14x128xf32>
    %201 = vector.extract_strided_slice %130 {offsets = [6, 0], sizes = [1, 128], strides = [1, 1]} : vector<8x128xf32> to vector<1x128xf32>
    %202 = vector.broadcast %201 : vector<1x128xf32> to vector<14x128xf32>
    %203 = arith.addf %200, %202 : vector<14x128xf32>
    %cst_81 = arith.constant 0.000000e+00 : f32
    %204 = vector.broadcast %cst_81 : f32 to vector<14x128xf32>
    %205 = arith.maximumf %203, %204 : vector<14x128xf32>
    %c1_82 = arith.constant 1 : index
    %c0_83 = arith.constant 0 : index
    %c0_84 = arith.constant 0 : index
    %206 = vector.load %arg8[%c1_82, %c0_83, %c0_84] : memref<2x128x32xf32, #tpu.memory_space<vmem>>, vector<1x128x32xf32>
    %207 = vector.shape_cast %206 : vector<1x128x32xf32> to vector<128x32xf32>
    %cst_85 = arith.constant dense<0.000000e+00> : vector<14x32xf32>
    %208 = tpu.matmul %205, %207, %cst_85 {dimension_numbers = #tpu.dot_dimension_numbers<[1], [0], [0], [1], [0, 0, 1, 1], [], []>} : vector<14x128xf32>, vector<128x32xf32>, vector<14x32xf32> -> vector<14x32xf32>
    %209 = vector.extract_strided_slice %130 {offsets = [5, 0], sizes = [1, 32], strides = [1, 1]} : vector<8x128xf32> to vector<1x32xf32>
    %210 = vector.broadcast %209 : vector<1x32xf32> to vector<14x32xf32>
    %211 = arith.addf %208, %210 : vector<14x32xf32>
    %212 = arith.addf %211, %197 : vector<14x32xf32>
    %213 = vector.extract_strided_slice %130 {offsets = [3, 0], sizes = [1, 32], strides = [1, 1]} : vector<8x128xf32> to vector<1x32xf32>
    %214 = vector.extract_strided_slice %130 {offsets = [4, 0], sizes = [1, 32], strides = [1, 1]} : vector<8x128xf32> to vector<1x32xf32>
    %cst_86 = arith.constant dense<0.000000e+00> : vector<14xf32>
    %215 = vector.multi_reduction <add>, %212, %cst_86 [1] : vector<14x32xf32> to vector<14xf32>
    %216 = vector.shape_cast %215 : vector<14xf32> to vector<14x1xf32>
    %cst_87 = arith.constant 3.200000e+01 : f32
    %217 = vector.broadcast %cst_87 : f32 to vector<14x1xf32>
    %218 = arith.divf %216, %217 : vector<14x1xf32>
    %219 = vector.broadcast %218 : vector<14x1xf32> to vector<14x32xf32>
    %220 = arith.subf %212, %219 : vector<14x32xf32>
    %221 = arith.mulf %220, %220 : vector<14x32xf32>
    %cst_88 = arith.constant dense<0.000000e+00> : vector<14xf32>
    %222 = vector.multi_reduction <add>, %221, %cst_88 [1] : vector<14x32xf32> to vector<14xf32>
    %223 = vector.shape_cast %222 : vector<14xf32> to vector<14x1xf32>
    %cst_89 = arith.constant 3.200000e+01 : f32
    %224 = vector.broadcast %cst_89 : f32 to vector<14x1xf32>
    %225 = arith.divf %223, %224 : vector<14x1xf32>
    %226 = vector.broadcast %218 : vector<14x1xf32> to vector<14x32xf32>
    %227 = arith.subf %212, %226 : vector<14x32xf32>
    %cst_90 = arith.constant 9.99999974E-6 : f32
    %228 = vector.broadcast %cst_90 : f32 to vector<14x1xf32>
    %229 = arith.addf %225, %228 : vector<14x1xf32>
    %230 = math.rsqrt %229 : vector<14x1xf32>
    %231 = vector.broadcast %230 : vector<14x1xf32> to vector<14x32xf32>
    %232 = arith.mulf %227, %231 : vector<14x32xf32>
    %233 = vector.broadcast %213 : vector<1x32xf32> to vector<14x32xf32>
    %234 = arith.mulf %232, %233 : vector<14x32xf32>
    %235 = vector.broadcast %214 : vector<1x32xf32> to vector<14x32xf32>
    %236 = arith.addf %234, %235 : vector<14x32xf32>
    %c0_91 = arith.constant 0 : index
    %c0_92 = arith.constant 0 : index
    %237 = vector.load %arg11[%c0_91, %c0_92] : memref<32x38xf32, #tpu.memory_space<vmem>>, vector<32x32xf32>
    %c0_93 = arith.constant 0 : index
    %c32 = arith.constant 32 : index
    %238 = vector.load %arg11[%c0_93, %c32] : memref<32x38xf32, #tpu.memory_space<vmem>>, vector<32x6xf32>
    %c0_94 = arith.constant 0 : index
    %c0_95 = arith.constant 0 : index
    %239 = vector.load %arg14[%c0_94, %c0_95] : memref<16x128xf32, #tpu.memory_space<vmem>>, vector<1x32xf32>
    %c0_96 = arith.constant 0 : index
    %c0_97 = arith.constant 0 : index
    %240 = vector.load %arg10[%c0_96, %c0_97] : memref<4x14xf32, #tpu.memory_space<vmem>>, vector<4x14xf32>
    %cst_98 = arith.constant dense<0.000000e+00> : vector<4x32xf32>
    %241 = tpu.matmul %240, %236, %cst_98 {dimension_numbers = #tpu.dot_dimension_numbers<[1], [0], [0], [1], [0, 0, 1, 1], [], []>} : vector<4x14xf32>, vector<14x32xf32>, vector<4x32xf32> -> vector<4x32xf32>
    %cst_99 = arith.constant dense<0.000000e+00> : vector<4x32xf32>
    %242 = tpu.matmul %241, %237, %cst_99 {dimension_numbers = #tpu.dot_dimension_numbers<[1], [0], [0], [1], [0, 0, 1, 1], [], []>} : vector<4x32xf32>, vector<32x32xf32>, vector<4x32xf32> -> vector<4x32xf32>
    %243 = vector.broadcast %239 : vector<1x32xf32> to vector<4x32xf32>
    %244 = arith.addf %242, %243 : vector<4x32xf32>
    %245 = vector.extract_strided_slice %244 {offsets = [0, 0], sizes = [2, 32], strides = [1, 1]} : vector<4x32xf32> to vector<2x32xf32>
    %246 = vector.extract_strided_slice %244 {offsets = [2, 0], sizes = [2, 32], strides = [1, 1]} : vector<4x32xf32> to vector<2x32xf32>
    %c0_100 = arith.constant 0 : index
    %c0_101 = arith.constant 0 : index
    %247 = vector.load %arg3[%c0_100, %c0_101] : memref<2x8xf32, #tpu.memory_space<vmem>>, vector<2x4xf32>
    %c0_102 = arith.constant 0 : index
    %c4 = arith.constant 4 : index
    %248 = vector.load %arg3[%c0_102, %c4] : memref<2x8xf32, #tpu.memory_space<vmem>>, vector<2x4xf32>
    %249 = tpu.concatenate %245, %247 in 1 : vector<2x32xf32>, vector<2x4xf32> -> vector<2x36xf32>
    %c0_103 = arith.constant 0 : index
    %c0_104 = arith.constant 0 : index
    %250 = vector.load %arg12[%c0_103, %c0_104] : memref<36x16xf32, #tpu.memory_space<vmem>>, vector<36x16xf32>
    %cst_105 = arith.constant dense<0.000000e+00> : vector<2x16xf32>
    %251 = tpu.matmul %249, %250, %cst_105 {dimension_numbers = #tpu.dot_dimension_numbers<[1], [0], [0], [1], [0, 0, 1, 1], [], []>} : vector<2x36xf32>, vector<36x16xf32>, vector<2x16xf32> -> vector<2x16xf32>
    %c1_106 = arith.constant 1 : index
    %c0_107 = arith.constant 0 : index
    %252 = vector.load %arg14[%c1_106, %c0_107] : memref<16x128xf32, #tpu.memory_space<vmem>>, vector<1x16xf32>
    %253 = vector.broadcast %252 : vector<1x16xf32> to vector<2x16xf32>
    %254 = arith.addf %251, %253 : vector<2x16xf32>
    %cst_108 = arith.constant 0.000000e+00 : f32
    %255 = vector.broadcast %cst_108 : f32 to vector<2x16xf32>
    %256 = arith.maximumf %254, %255 : vector<2x16xf32>
    %c0_109 = arith.constant 0 : index
    %c0_110 = arith.constant 0 : index
    %257 = vector.load %arg13[%c0_109, %c0_110] : memref<16x4xf32, #tpu.memory_space<vmem>>, vector<16x4xf32>
    %cst_111 = arith.constant dense<0.000000e+00> : vector<2x4xf32>
    %258 = tpu.matmul %256, %257, %cst_111 {dimension_numbers = #tpu.dot_dimension_numbers<[1], [0], [0], [1], [0, 0, 1, 1], [], []>} : vector<2x16xf32>, vector<16x4xf32>, vector<2x4xf32> -> vector<2x4xf32>
    %c2 = arith.constant 2 : index
    %c0_112 = arith.constant 0 : index
    %259 = vector.load %arg14[%c2, %c0_112] : memref<16x128xf32, #tpu.memory_space<vmem>>, vector<1x4xf32>
    %260 = vector.broadcast %259 : vector<1x4xf32> to vector<2x4xf32>
    %261 = arith.addf %258, %260 : vector<2x4xf32>
    %262 = arith.addf %261, %248 : vector<2x4xf32>
    %cst_113 = arith.constant 1.000000e+00 : f32
    %263 = vector.broadcast %cst_113 : f32 to vector<2x4xf32>
    %264 = arith.mulf %262, %263 : vector<2x4xf32>
    %cst_114 = arith.constant dense<0xFF800000> : vector<2xf32>
    %265 = vector.multi_reduction <maximumf>, %264, %cst_114 [1] : vector<2x4xf32> to vector<2xf32>
    %266 = vector.shape_cast %265 : vector<2xf32> to vector<2x1xf32>
    %267 = vector.broadcast %266 : vector<2x1xf32> to vector<2x4xf32>
    %268 = arith.subf %264, %267 : vector<2x4xf32>
    %269 = math.exp %268 : vector<2x4xf32>
    %cst_115 = arith.constant dense<0.000000e+00> : vector<2xf32>
    %270 = vector.multi_reduction <add>, %269, %cst_115 [1] : vector<2x4xf32> to vector<2xf32>
    %271 = vector.shape_cast %270 : vector<2xf32> to vector<2x1xf32>
    %272 = tpu.reciprocal %271 {approx = true} : vector<2x1xf32> -> vector<2x1xf32>
    %273 = vector.broadcast %272 : vector<2x1xf32> to vector<2x4xf32>
    %274 = arith.mulf %269, %273 : vector<2x4xf32>
    %c3 = arith.constant 3 : index
    %c0_116 = arith.constant 0 : index
    %275 = vector.load %arg14[%c3, %c0_116] : memref<16x128xf32, #tpu.memory_space<vmem>>, vector<1x7xf32>
    %c4_117 = arith.constant 4 : index
    %c0_118 = arith.constant 0 : index
    %276 = vector.load %arg14[%c4_117, %c0_118] : memref<16x128xf32, #tpu.memory_space<vmem>>, vector<1x32xf32>
    %c8 = arith.constant 8 : index
    %c0_119 = arith.constant 0 : index
    %277 = vector.load %arg14[%c8, %c0_119] : memref<16x128xf32, #tpu.memory_space<vmem>>, vector<4x7xf32>
    %cst_120 = arith.constant dense<0.000000e+00> : vector<2x7xf32>
    %278 = tpu.matmul %274, %277, %cst_120 {dimension_numbers = #tpu.dot_dimension_numbers<[1], [0], [0], [1], [0, 0, 1, 1], [], []>} : vector<2x4xf32>, vector<4x7xf32>, vector<2x7xf32> -> vector<2x7xf32>
    %cst_121 = arith.constant dense<0.000000e+00> : vector<2x6xf32>
    %279 = tpu.matmul %246, %238, %cst_121 {dimension_numbers = #tpu.dot_dimension_numbers<[1], [0], [0], [1], [0, 0, 1, 1], [], []>} : vector<2x32xf32>, vector<32x6xf32>, vector<2x6xf32> -> vector<2x6xf32>
    %280 = vector.extract_strided_slice %275 {offsets = [0, 0], sizes = [1, 6], strides = [1, 1]} : vector<1x7xf32> to vector<1x6xf32>
    %281 = vector.broadcast %280 : vector<1x6xf32> to vector<2x6xf32>
    %282 = arith.addf %279, %281 : vector<2x6xf32>
    %283 = vector.extract_strided_slice %278 {offsets = [0, 0], sizes = [2, 6], strides = [1, 1]} : vector<2x7xf32> to vector<2x6xf32>
    %284 = arith.addf %282, %283 : vector<2x6xf32>
    %cst_122 = arith.constant dense<0.000000e+00> : vector<1x14xf32>
    %285 = tpu.matmul %276, %236, %cst_122 {dimension_numbers = #tpu.dot_dimension_numbers<[1], [1], [0], [0], [0, 0, 1, 0], [], []>} : vector<1x32xf32>, vector<14x32xf32>, vector<1x14xf32> -> vector<1x14xf32>
    %286 = vector.extract_strided_slice %285 {offsets = [0, 1], sizes = [1, 3], strides = [1, 1]} : vector<1x14xf32> to vector<1x3xf32>
    %287 = vector.extract_strided_slice %285 {offsets = [0, 8], sizes = [1, 3], strides = [1, 1]} : vector<1x14xf32> to vector<1x3xf32>
    %288 = tpu.concatenate %286, %287 in 0 : vector<1x3xf32>, vector<1x3xf32> -> vector<2x3xf32>
    %289 = vector.extract_strided_slice %275 {offsets = [0, 6], sizes = [1, 1], strides = [1, 1]} : vector<1x7xf32> to vector<1x1xf32>
    %290 = vector.broadcast %289 : vector<1x1xf32> to vector<2x3xf32>
    %291 = arith.addf %288, %290 : vector<2x3xf32>
    %292 = vector.extract_strided_slice %278 {offsets = [0, 6], sizes = [2, 1], strides = [1, 1]} : vector<2x7xf32> to vector<2x1xf32>
    %293 = vector.broadcast %292 : vector<2x1xf32> to vector<2x3xf32>
    %294 = arith.addf %291, %293 : vector<2x3xf32>
    %cst_123 = arith.constant 0.000000e+00 : f32
    %295 = vector.broadcast %cst_123 : f32 to vector<2x83xf32>
    %296 = tpu.concatenate %245, %274, %284, %294, %295 in 1 : vector<2x32xf32>, vector<2x4xf32>, vector<2x6xf32>, vector<2x3xf32>, vector<2x83xf32> -> vector<2x128xf32>
    %c0_124 = arith.constant 0 : index
    %c0_125 = arith.constant 0 : index
    %297 = vector.load %arg15[%c0_124, %c0_125] : memref<2x128xf32, #tpu.memory_space<vmem>>, vector<2x128xf32>
    tpu.vector_store %arg15[%c0_124, %c0_125], %296 {strides = array<i32>} : memref<2x128xf32, #tpu.memory_space<vmem>>, vector<2x128xf32>,
    return
  }
  func.func @transform_0(%arg0: i32) -> (i32, i32) {
    %c0_i32 = arith.constant 0 : i32
    %c0_i32_0 = arith.constant 0 : i32
    %c0_i32_1 = arith.constant 0 : i32
    return %c0_i32, %c0_i32_0 : i32, i32
  }
  func.func @transform_1(%arg0: i32) -> (i32, i32) {
    %c0_i32 = arith.constant 0 : i32
    %c0_i32_0 = arith.constant 0 : i32
    %c0_i32_1 = arith.constant 0 : i32
    return %c0_i32, %c0_i32_0 : i32, i32
  }
  func.func @transform_2(%arg0: i32) -> (i32, i32) {
    %c0_i32 = arith.constant 0 : i32
    %c0_i32_0 = arith.constant 0 : i32
    %c0_i32_1 = arith.constant 0 : i32
    return %c0_i32, %c0_i32_0 : i32, i32
  }
  func.func @transform_3(%arg0: i32) -> (i32, i32) {
    %c0_i32 = arith.constant 0 : i32
    %c0_i32_0 = arith.constant 0 : i32
    %c0_i32_1 = arith.constant 0 : i32
    return %c0_i32, %c0_i32_0 : i32, i32
  }
  func.func @transform_4(%arg0: i32) -> (i32, i32, i32) {
    %c0_i32 = arith.constant 0 : i32
    %c0_i32_0 = arith.constant 0 : i32
    %c0_i32_1 = arith.constant 0 : i32
    %c0_i32_2 = arith.constant 0 : i32
    return %c0_i32, %c0_i32_0, %c0_i32_1 : i32, i32, i32
  }
  func.func @transform_5(%arg0: i32) -> (i32, i32, i32) {
    %c0_i32 = arith.constant 0 : i32
    %c0_i32_0 = arith.constant 0 : i32
    %c0_i32_1 = arith.constant 0 : i32
    %c0_i32_2 = arith.constant 0 : i32
    return %c0_i32, %c0_i32_0, %c0_i32_1 : i32, i32, i32
  }
  func.func @transform_6(%arg0: i32) -> (i32, i32, i32) {
    %c0_i32 = arith.constant 0 : i32
    %c0_i32_0 = arith.constant 0 : i32
    %c0_i32_1 = arith.constant 0 : i32
    %c0_i32_2 = arith.constant 0 : i32
    return %c0_i32, %c0_i32_0, %c0_i32_1 : i32, i32, i32
  }
  func.func @transform_7(%arg0: i32) -> (i32, i32, i32) {
    %c0_i32 = arith.constant 0 : i32
    %c0_i32_0 = arith.constant 0 : i32
    %c0_i32_1 = arith.constant 0 : i32
    %c0_i32_2 = arith.constant 0 : i32
    return %c0_i32, %c0_i32_0, %c0_i32_1 : i32, i32, i32
  }
  func.func @transform_8(%arg0: i32) -> (i32, i32, i32) {
    %c0_i32 = arith.constant 0 : i32
    %c0_i32_0 = arith.constant 0 : i32
    %c0_i32_1 = arith.constant 0 : i32
    %c0_i32_2 = arith.constant 0 : i32
    return %c0_i32, %c0_i32_0, %c0_i32_1 : i32, i32, i32
  }
  func.func @transform_9(%arg0: i32) -> (i32, i32) {
    %c0_i32 = arith.constant 0 : i32
    %c0_i32_0 = arith.constant 0 : i32
    %c0_i32_1 = arith.constant 0 : i32
    return %c0_i32, %c0_i32_0 : i32, i32
  }
  func.func @transform_10(%arg0: i32) -> (i32, i32) {
    %c0_i32 = arith.constant 0 : i32
    %c0_i32_0 = arith.constant 0 : i32
    %c0_i32_1 = arith.constant 0 : i32
    return %c0_i32, %c0_i32_0 : i32, i32
  }
  func.func @transform_11(%arg0: i32) -> (i32, i32) {
    %c0_i32 = arith.constant 0 : i32
    %c0_i32_0 = arith.constant 0 : i32
    %c0_i32_1 = arith.constant 0 : i32
    return %c0_i32, %c0_i32_0 : i32, i32
  }
  func.func @transform_12(%arg0: i32) -> (i32, i32) {
    %c0_i32 = arith.constant 0 : i32
    %c0_i32_0 = arith.constant 0 : i32
    %c0_i32_1 = arith.constant 0 : i32
    return %c0_i32, %c0_i32_0 : i32, i32
  }
  func.func @transform_13(%arg0: i32) -> (i32, i32) {
    %c0_i32 = arith.constant 0 : i32
    %c0_i32_0 = arith.constant 0 : i32
    %c0_i32_1 = arith.constant 0 : i32
    return %c0_i32, %c0_i32_0 : i32, i32
  }
  func.func @transform_14(%arg0: i32) -> (i32, i32) {
    %c0_i32 = arith.constant 0 : i32
    %c0_i32_0 = arith.constant 0 : i32
    %c0_i32_1 = arith.constant 0 : i32
    return %c0_i32, %c0_i32_0 : i32, i32
  }
}

</mosaic_0001>

<bundles_post_ra>
// kernel: phase_updet2_forward.1
= control target key start
LH: loop header
LB: loop body
LE: loop exit
PB: predicated region body
PF: predicated region fallthrough
CT: control target
= control target key end

     0   :  { %vm53_vm0 = vcmask 130048   ;;  %vm107_vm1 = vcmask 261120   ;;  %s1507_s23 = smov 96   ;;  %s1508_s24 = smov 64   ;;  %vm221_vm2 = vcmask 1045504   ;;  %v83_v32 = vlaneseq  ;;  %s2096_s3 = inlined_call_operand.vmem [shape: f32[16,32], index: 3, kind: input, shape index: {}]   ;;  %s2097_s0 = inlined_call_operand.vmem [shape: f32[14,16], index: 0, kind: input, shape index: {}]   ;;  %s2098_s4 = inlined_call_operand.vmem [shape: f32[2,32,192], index: 4, kind: input, shape index: {}]   ;;  %s2099_s1 = inlined_call_operand.vmem [shape: f32[14,32], index: 1, kind: input, shape index: {}]   ;;  %s2100_s5 = inlined_call_operand.vmem [shape: f32[2,64,32], index: 5, kind: input, shape index: {}]   ;;  %s2101_s8 = inlined_call_operand.vmem [shape: f32[2,8,128], index: 8, kind: input, shape index: {}]   ;;  %s2102_s6 = inlined_call_operand.vmem [shape: f32[2,32,128], index: 6, kind: input, shape index: {}]   ;;  %s2103_s7 = inlined_call_operand.vmem [shape: f32[2,128,32], index: 7, kind: input, shape index: {}]   ;;  %s2104_s10 = inlined_call_operand.vmem [shape: f32[32,38], index: 10, kind: input, shape index: {}]   ;;  %s2105_s9 = inlined_call_operand.vmem [shape: f32[4,14], index: 9, kind: input, shape index: {}]   ;;  %s2106_s12 = inlined_call_operand.vmem [shape: f32[16,4], index: 12, kind: input, shape index: {}]   ;;  %s2107_s13 = inlined_call_operand.vmem [shape: f32[16,128], index: 13, kind: input, shape index: {}]   ;;  %s2108_s2 = inlined_call_operand.vmem [shape: f32[2,8], index: 2, kind: input, shape index: {}]   ;;  %s2109_s11 = inlined_call_operand.vmem [shape: f32[36,16], index: 11, kind: input, shape index: {}]   ;;  %s2110_s14 = inlined_call_operand.vmem [shape: f32[2,128], index: 14, kind: output, shape index: {}]  }
   0x1   :  { %v50_v0 = vld [vmem:[%s2096_s3 + $0x8] sm:$0xff]  ;;  %v49_v1 = vld [vmem:[%s2096_s3] sm:$0xff]  ;;  %v105_v3 = vld [vmem:[%s2098_s4 + $0x30] sm:$0xff]  ;;  %v1510_v35 = vmov 1.0   ;;  %v1511_v38 = vmov -1e+30  }
   0x2   :  { %74 = vmatpush.msra.mxu0 %v50_v0  ;;  %v47_v2 = vld [vmem:[%s2097_s0] sm:$0xff]  ;;  %v106_v4 = vld [vmem:[%s2098_s4 + $0x38] sm:$0xff]  ;;  %126 = vmatpush.msra.mxu1 %v105_v3  ;;  %v104_v6 = vld [vmem:[%s2098_s4 + $0x28] sm:$0xff]  ;;  %v84_v33 = vshrl.u32 %v83_v32, 7  ;;  %v91_v34 = vand.u32 127, %v83_v32  ;;  %vm203_vm6 = vcmask 113664  }
   0x3   :  { %149 = vmatpush.msra.mxu2 %v106_v4  ;;  %v103_v5 = vld [vmem:[%s2098_s4 + $0x20] sm:$0xff]  ;;  %v48_v7 = vld [vmem:[%s2097_s0 + $0x8] sm:$0x3f]  ;;  %v101_v8 = vld [vmem:[%s2098_s4 + $0x10] sm:$0xff]  ;;  %vm207_vm8 = vcmask 111616   ;;  %vm357_vm9 = vcmask 523264  }
   0x4   :  { %75 = vmatpush.msra.mxu0 %v49_v1  ;;  %127 = vmatpush.msra.mxu1 %v103_v5  ;;  %v102_v9 = vld [vmem:[%s2098_s4 + $0x18] sm:$0xff]  ;;  %v99_v10 = vld [vmem:[%s2098_s4] sm:$0xff]  ;;  %v100_v11 = vld [vmem:[%s2098_s4 + $0x8] sm:$0xff]  ;;  %vm86_vm3 = vcmp.lt.s32.totalorder %v84_v33, 7  ;;  %vm92_vm4 = vcmp.lt.s32.totalorder %v91_v34, 7  ;;  %vm392_vm10 = vcmask 259072  }
   0x5   :  { %1327 = vmatmul.msk.f32.vlgmr.msra.gmra.mxu0 %vm53_vm0, %v47_v2  ;;  %150 = vmatpush.msra.mxu2 %v104_v6  ;;  %v51_v12 = vld [vmem:[%s2099_s1] sm:$0xff]  ;;  %v52_v15 = vld [vmem:[%s2099_s1 + $0x8] sm:$0x3f]  ;;  %s1509_s1 = smov 32   ;;  %v88_v36 = vsel %vm86_vm3, 0.0, %v1510_v35  ;;  %v93_v37 = vsel %vm92_vm4, 0.0, %v1510_v35 }
   0x6   :  { %128 = vmatpush.msra.mxu1 %v101_v8  ;;  %vm94_vm5 = vcmp.eq.f32.partialorder %v88_v36, %v93_v37  ;;  %vm1329_vm7 = vcmp.eq.f32.partialorder %v93_v37, 1.0  ;;  %v1512_v37 = vmov 32.0   ;;  %s1513_s17 = smov 124   ;;  %s1514_s20 = smov 122  }
   0x7   :  { %151 = vmatpush.msra.mxu2 %v102_v9  ;;  %v1668_v39 = vsel %vm94_vm5, 0.0, %v1511_v38  ;;  %v1673_v48 = vsel %vm1329_vm7, 0.0, %v1511_v38  ;;  %s1515_s21 = smov 121   ;;  %s1518_s26 = smov 41  }
   0x8   :  { %129 = vmatpush.msra.mxu1 %v99_v10 }
   0x9   :  { %152 = vmatpush.msra.mxu2 %v100_v11  ;;  %v355_v11 = vld [vmem:[%s2100_s5 + $0x38] sm:$0xff] }
   0xd   :  { %1328 = vmatmul.msk.f32.gmra.mxu0 %vm53_vm0, %v48_v7 }
  0x82   :  { %v77_v13 = vpop.f32.mrf.mxu0 }
  0x83   :  { %v1635_v14 = vadd.f32 %v77_v13, %v51_v12  ;;  %v354_v12 = vld [vmem:[%s2100_s5 + $0x30] sm:$0xff]  ;;  %v353_v13 = vld [vmem:[%s2100_s5 + $0x28] sm:$0xff] }
  0x85   :  { %1330 = vmatmul.msk.f32.vlgmr.msra.gmra.mxu1 %vm107_vm1, %v1635_v14  ;;  %1332 = vmatmul.msk.f32.vlgmr.msra.gmra.mxu2 %vm107_vm1, %v1635_v14 }
  0x8a   :  { %v80_v16 = vpop.f32.mrf.mxu0 }
  0x8b   :  { %v1644_v17 = vadd.f32 %v80_v16, %v52_v15  ;;  %v352_v15 = vld [vmem:[%s2100_s5 + $0x20] sm:$0xff]  ;;  %v351_v16 = vld [vmem:[%s2100_s5 + $0x18] sm:$0xff] }
  0x8d   :  { %1331 = vmatmul.msk.f32.gmra.mxu1 %vm107_vm1, %v1644_v17  ;;  %1333 = vmatmul.msk.f32.gmra.mxu2 %vm107_vm1, %v1644_v17 }
 0x102   :  { %v131_v18 = vpop.f32.mrf.mxu1 }
 0x103   :  { %v160_v19 = vmul.f32 0.4204482, %v131_v18  ;;  %v350_v18 = vld [vmem:[%s2100_s5 + $0x10] sm:$0xff] }
 0x105   :  { %248 = vrot.lane.b32.xlu1 %v160_v19, %s1507_s23 }
 0x108   :  { %v154_v20 = vpop.f32.mrf.mxu2 }
 0x10a   :  { %v134_v21 = vpop.f32.mrf.mxu1 }
 0x10b   :  { %v161_v22 = vmul.f32 0.4204482, %v134_v21 }
 0x10d   :  { %166 = vrot.lane.b32.xlu2 %v161_v22, %s1508_s24  ;;  %250 = vrot.lane.b32.xlu1 %v161_v22, %s1507_s23 }
 0x10e   :  { %254 = vrot.lane.b32.xlu0 %v161_v22, %s1509_s1 }
 0x110   :  { %v157_v23 = vpop.f32.mrf.mxu2 }
 0x111   :  { %1338 = vmatpush.msk.msrb.mxu0 %vm221_vm2, %v157_v23 }
 0x113   :  { %240 = vmatpush.msrb.mxu0 %v154_v20 }
 0x115   :  { %164 = vrot.lane.b32.xlu2 %v160_v19, %s1508_s24  ;;  %304 = vrot.lane.b32.xlu1 %v157_v23, %s1507_s23 }
 0x116   :  { %252 = vrot.lane.b32.xlu0 %v160_v19, %s1509_s1 }
 0x11d   :  { %302 = vrot.lane.b32.xlu1 %v154_v20, %s1507_s23  ;;  %v348_v20 = vld [vmem:[%s2100_s5] sm:$0xff] }
 0x167   :  { %v167_v24 = vpop.permute.xlu2 %166 }
 0x168   :  { %1334 = vmatpush.xpose.msk.msra.mxu3 %vm107_vm1, %v167_v24 }
 0x16f   :  { %v165_v25 = vpop.permute.xlu2 %164 }
 0x170   :  { %1335 = vmatpush.xpose.msk.msra.mxu3 %vm107_vm1, %v165_v25 }
 0x173   :  { %1336 = vmatmul.msk.f32.vlgmr.msra.gmra.mxu3 %vm107_vm1, %v160_v19  ;;  %v349_v19 = vld [vmem:[%s2100_s5 + $0x8] sm:$0xff] }
 0x174   :  { %372 = vmatpush.msrb.mxu3 %v355_v11  ;;  %v491_v11 = vld [vmem:[%s2103_s7 + $0x40] sm:$0xff] }
 0x176   :  { %373 = vmatpush.msrb.mxu3 %v354_v12 }
 0x177   :  { %v249_v26 = vpop.permute.xlu1 %248 }
 0x178   :  { %374 = vmatpush.msrb.mxu3 %v353_v13 }
 0x17a   :  { %375 = vmatpush.msrb.mxu3 %v352_v15  ;;  %v490_v15 = vld [vmem:[%s2103_s7 + $0x38] sm:$0xff] }
 0x17b   :  { %1337 = vmatmul.msk.f32.gmra.mxu3 %vm107_vm1, %v161_v22 }
 0x17c   :  { %376 = vmatpush.msrb.mxu3 %v351_v16 }
 0x17e   :  { %377 = vmatpush.msrb.mxu3 %v350_v18 }
 0x17f   :  { %v251_v27 = vpop.permute.xlu1 %250 }
 0x180   :  { %v255_v28 = vpop.permute.xlu0 %254  ;;  %378 = vmatpush.msrb.mxu3 %v349_v19 }
 0x181   :  { %1341 = vmatpush.xpose.msk.msrb.mxu1 %vm107_vm1, %v255_v28 }
 0x182   :  { %379 = vmatpush.msrb.mxu3 %v348_v20  ;;  %v489_v20 = vld [vmem:[%s2103_s7 + $0x30] sm:$0xff] }
 0x187   :  { %v305_v29 = vpop.permute.xlu1 %304 }
 0x188   :  { %v253_v30 = vpop.permute.xlu0 %252  ;;  %1345 = vmatpush.msk.msrb.mxu2 %vm221_vm2, %v305_v29 }
 0x189   :  { %1342 = vmatpush.xpose.msk.msrb.mxu1 %vm107_vm1, %v253_v30 }
 0x18c   :  { %1343 = vmatmul.msk.f32.vlgmr.msrb.gmra.mxu1 %vm107_vm1, %v249_v26 }
 0x18f   :  { %v303_v31 = vpop.permute.xlu1 %302 }
 0x190   :  { %330 = vmatpush.msrb.mxu2 %v303_v31 }
 0x194   :  { %1344 = vmatmul.msk.f32.gmra.mxu1 %vm107_vm1, %v251_v27  ;;  %v1717_v27 = vld [vmem:[%s2101_s8] sm:$0xff] }
 0x195   :  { %v356_v28 = vperm.slane %v1717_v27, 0  ;;  %v441_v19 = vperm.slane %v1717_v27, 1 }
 0x1f6   :  { %v193_v40 = vpop.f32.mrf.mxu3 }
 0x1f7   :  { %v194_v41 = vadd.f32 %v193_v40, %v1668_v39 }
 0x1f9   :  { %v199_v42 = vmul.f32 1.442695, %v194_v41 }
 0x1fb   :  { %1453 = vpow2.f32 %v199_v42 }
 0x1fe   :  { %v196_v49 = vpop.f32.mrf.mxu3 }
 0x1ff   :  { %v197_v53 = vadd.f32 %v196_v49, %v1673_v48 }
 0x201   :  { %v1454_v43 = vpop.eup %1453  ;;  %v201_v56 = vmul.f32 1.442695, %v197_v53 }
 0x202   :  { %v204_v44 = vsel %vm203_vm6, %v1454_v43, 0.0 }
 0x203   :  { %205 = vadd.xlane.f32.xlu1 %v204_v44 }
 0x209   :  { %v281_v45 = vpop.f32.mrf.mxu1 }
 0x20a   :  { %v282_v46 = vadd.f32 %v281_v45, %v1668_v39 }
 0x20c   :  { %v287_v47 = vmul.f32 1.442695, %v282_v46 }
 0x20e   :  { %1455 = vpow2.f32 %v287_v47 }
 0x211   :  { %v284_v50 = vpop.f32.mrf.mxu1 }
 0x212   :  { %v285_v51 = vadd.f32 %v284_v50, %v1673_v48 }
 0x214   :  { %v1456_v52 = vpop.eup %1455  ;;  %v289_v54 = vmul.f32 1.442695, %v285_v51 }
 0x215   :  { %v291_v55 = vsel %vm203_vm6, %v1456_v52, 0.0 }
 0x216   :  { %1457 = vpow2.f32 %v289_v54  ;;  %292 = vadd.xlane.f32.xlu0 %v291_v55  ;;  %v450_v54 = vld [vmem:[%s2102_s6 + $0x18] sm:$0xff]  ;;  %v449_v55 = vld [vmem:[%s2102_s6 + $0x10] sm:$0xff] }
 0x217   :  { %1459 = vpow2.f32 %v201_v56  ;;  %470 = vmatpush.msra.mxu0 %v450_v54  ;;  %v448_v56 = vld [vmem:[%s2102_s6 + $0x8] sm:$0xff] }
 0x219   :  { %471 = vmatpush.msra.mxu0 %v449_v55 }
 0x21b   :  { %472 = vmatpush.msra.mxu0 %v448_v56 }
 0x21c   :  { %v1458_v57 = vpop.eup %1457 }
 0x21d   :  { %v294_v58 = vsel %vm207_vm8, %v1458_v57, 0.0  ;;  %v1460_v59 = vpop.eup %1459 }
 0x21e   :  { %295 = vadd.xlane.f32.xlu2 %v294_v58  ;;  %v208_v60 = vsel %vm207_vm8, %v1460_v59, 0.0 }
 0x226   :  { %209 = vadd.xlane.f32.xlu2 %v208_v60 }
 0x276   :  { %v206_v61 = vpop.xlane.xlu1 %205 }
 0x277   :  { %1461 = vrcp.f32 %v206_v61  ;;  %v498_v61 = vld [vmem:[%s2103_s7 + $0x78] sm:$0xff] }
 0x278   :  { %500 = vmatpush.msra.mxu1 %v498_v61 }
 0x27d   :  { %v1462_v62 = vpop.eup %1461 }
 0x27e   :  { %v213_v63 = vmul.f32 %v1462_v62, %v1454_v43  ;;  %v497_v62 = vld [vmem:[%s2103_s7 + $0x70] sm:$0xff] }
 0x27f   :  { %501 = vmatpush.msra.mxu1 %v497_v62 }
 0x280   :  { %1339 = vmatmul.msk.f32.vlgmr.msrb.gmra.mxu0 %vm203_vm6, %v213_v63  ;;  %v496_v63 = vld [vmem:[%s2103_s7 + $0x68] sm:$0xff] }
 0x281   :  { %502 = vmatpush.msra.mxu1 %v496_v63 }
 0x289   :  { %v293_v0 = vpop.xlane.xlu0 %292 }
 0x28a   :  { %1463 = vrcp.f32 %v293_v0 }
 0x290   :  { %v1464_v1 = vpop.eup %1463 }
 0x291   :  { %v296_v2 = vpop.xlane.xlu2 %295  ;;  %v299_v3 = vmul.f32 %v1464_v1, %v1456_v52 }
 0x292   :  { %1465 = vrcp.f32 %v296_v2  ;;  %v495_v2 = vld [vmem:[%s2103_s7 + $0x60] sm:$0xff] }
 0x293   :  { %1346 = vmatmul.msk.f32.vlgmr.msrb.gmra.mxu2 %vm203_vm6, %v299_v3  ;;  %503 = vmatpush.msra.mxu1 %v495_v2 }
 0x298   :  { %v1466_v4 = vpop.eup %1465 }
 0x299   :  { %v210_v5 = vpop.xlane.xlu2 %209  ;;  %v300_v6 = vmul.f32 %v1466_v4, %v1458_v57  ;;  %v447_v57 = vld [vmem:[%s2102_s6] sm:$0xff] }
 0x29a   :  { %1467 = vrcp.f32 %v210_v5  ;;  %473 = vmatpush.msra.mxu0 %v447_v57  ;;  %v494_v5 = vld [vmem:[%s2103_s7 + $0x58] sm:$0xff] }
 0x29b   :  { %1347 = vmatmul.msk.f32.gmra.mxu2 %vm203_vm6, %v300_v6  ;;  %1469 = vrcp.f32 %v1512_v37  ;;  %504 = vmatpush.msra.mxu1 %v494_v5  ;;  %v1360_v5 = vld [vmem:[%s2098_s4 + $0x78] sm:$0xff] }
 0x29c   :  { %627 = vmatpush.msra.mxu3 %v1360_v5 }
 0x2a0   :  { %v1468_v7 = vpop.eup %1467 }
 0x2a1   :  { %v214_v8 = vmul.f32 %v1468_v7, %v1460_v59  ;;  %v1470_v38 = vpop.eup %1469  ;;  %v493_v7 = vld [vmem:[%s2103_s7 + $0x50] sm:$0xff] }
 0x2a2   :  { %v397_v40 = vmul.f32 32.0, %v1470_v38  ;;  %vm401_vm11 = vweird.f32 %v1470_v38  ;;  %505 = vmatpush.msra.mxu1 %v493_v7  ;;  %v1358_v7 = vld [vmem:[%s2098_s4 + $0x68] sm:$0xff] }
 0x2a3   :  { %1340 = vmatmul.msk.f32.gmra.mxu0 %vm203_vm6, %v214_v8  ;;  %628 = vmatpush.msra.mxu3 %v1358_v7 }
 0x2a4   :  { %v398_v41 = vsub.f32 1.0, %v397_v40  ;;  %v484_v40 = vld [vmem:[%s2103_s7 + $0x8] sm:$0xff] }
 0x2a6   :  { %v399_v42 = vmul.f32 %v1470_v38, %v398_v41  ;;  %v483_v41 = vld [vmem:[%s2103_s7] sm:$0xff] }
 0x2a8   :  { %v400_v43 = vadd.f32 %v1470_v38, %v399_v42  ;;  %v451_v42 = vperm.slane %v1717_v27, 6 }
 0x2fd   :  { %v242_v21 = vpop.f32.mrf.mxu0 }
 0x316   :  { %v332_v9 = vpop.f32.mrf.mxu2 }
 0x317   :  { %340 = vrot.lane.b32.xlu0 %v332_v9, %s1509_s1  ;;  %v492_v9 = vld [vmem:[%s2103_s7 + $0x48] sm:$0xff] }
 0x318   :  { %506 = vmatpush.msra.mxu1 %v492_v9  ;;  %v1356_v9 = vld [vmem:[%s2098_s4 + $0x58] sm:$0xff] }
 0x319   :  { %629 = vmatpush.msra.mxu3 %v1356_v9 }
 0x31a   :  { %507 = vmatpush.msra.mxu1 %v491_v11  ;;  %v1354_v11 = vld [vmem:[%s2098_s4 + $0x48] sm:$0xff] }
 0x31b   :  { %630 = vmatpush.msra.mxu3 %v1354_v11 }
 0x31c   :  { %508 = vmatpush.msra.mxu1 %v490_v15 }
 0x31e   :  { %v335_v10 = vpop.f32.mrf.mxu2  ;;  %509 = vmatpush.msra.mxu1 %v489_v20 }
 0x31f   :  { %342 = vrot.lane.b32.xlu2 %v335_v10, %s1509_s1 }
 0x320   :  { %v245_v25 = vpop.f32.mrf.mxu0 }
 0x379   :  { %v343_v24 = vpop.permute.xlu2 %342 }
 0x37a   :  { %v347_v26 = vsel %vm107_vm1, %v245_v25, %v343_v24  ;;  %v444_v24 = vperm.slane %v1717_v27, 2  ;;  %v488_v25 = vld [vmem:[%s2103_s7 + $0x28] sm:$0xff] }
 0x37b   :  { %510 = vmatpush.msra.mxu1 %v488_v25 }
 0x389   :  { %v341_v22 = vpop.permute.xlu0 %340 }
 0x38a   :  { %v346_v23 = vsel %vm107_vm1, %v242_v21, %v341_v22 }
 0x38b   :  { %1348 = vmatmul.msk.f32.vlgmr.msrb.gmra.mxu3 %vm357_vm9, %v346_v23 }
 0x393   :  { %1349 = vmatmul.msk.f32.gmra.mxu3 %vm357_vm9, %v347_v26 }
 0x40e   :  { %v381_v29 = vpop.f32.mrf.mxu3 }
 0x40f   :  { %v382_v30 = vadd.f32 %v381_v29, %v356_v28  ;;  %v487_v29 = vld [vmem:[%s2103_s7 + $0x20] sm:$0xff] }
 0x410   :  { %511 = vmatpush.msra.mxu1 %v487_v29  ;;  %v569_v29 = vperm.slane %v1717_v27, 3 }
 0x411   :  { %v387_v31 = vadd.f32 %v382_v30, %v1635_v14  ;;  %v1724_v14 = vsel %vm401_vm11, %v1470_v38, %v400_v43  ;;  %v485_v38 = vld [vmem:[%s2103_s7 + $0x10] sm:$0xff] }
 0x413   :  { %v389_v32 = vsel %vm107_vm1, %v387_v31, 0.0 }
 0x414   :  { %390 = vadd.xlane.f32.xlu1 %v389_v32  ;;  %v486_v32 = vld [vmem:[%s2103_s7 + $0x18] sm:$0xff] }
 0x415   :  { %512 = vmatpush.msra.mxu1 %v486_v32 }
 0x416   :  { %v384_v33 = vpop.f32.mrf.mxu3 }
 0x417   :  { %v385_v34 = vadd.f32 %v384_v33, %v356_v28  ;;  %513 = vmatpush.msra.mxu1 %v485_v38 }
 0x419   :  { %v388_v35 = vadd.f32 %v385_v34, %v1644_v17  ;;  %514 = vmatpush.msra.mxu1 %v484_v40 }
 0x41b   :  { %v393_v36 = vsel %vm392_vm10, %v388_v35, 0.0  ;;  %515 = vmatpush.msra.mxu1 %v483_v41 }
 0x41c   :  { %394 = vadd.xlane.f32.xlu0 %v393_v36 }
 0x487   :  { %v391_v44 = vpop.xlane.xlu1 %390 }
 0x488   :  { %v403_v45 = vmul.f32 %v1724_v14, %v391_v44 }
 0x48a   :  { %v405_v46 = vsub.f32 %v387_v31, %v403_v45 }
 0x48c   :  { %v407_v47 = vmul.f32 %v405_v46, %v405_v46 }
 0x48e   :  { %v409_v17 = vsel %vm107_vm1, %v407_v47, 0.0 }
 0x48f   :  { %410 = vadd.xlane.f32.xlu1 %v409_v17  ;;  %v395_v49 = vpop.xlane.xlu0 %394 }
 0x490   :  { %v404_v50 = vmul.f32 %v1724_v14, %v395_v49  ;;  %v499_v49 = vperm.slane %v1717_v27, 5 }
 0x492   :  { %v1729_v51 = vsub.f32 %v388_v35, %v404_v50 }
 0x494   :  { %v408_v52 = vmul.f32 %v1729_v51, %v1729_v51 }
 0x496   :  { %v412_v53 = vsel %vm392_vm10, %v408_v52, 0.0 }
 0x497   :  { %413 = vadd.xlane.f32.xlu2 %v412_v53 }
 0x502   :  { %v411_v58 = vpop.xlane.xlu1 %410 }
 0x503   :  { %v415_v59 = vmul.f32 %v411_v58, %v1724_v14 }
 0x505   :  { %v417_v60 = vadd.f32 1e-05, %v415_v59 }
 0x507   :  { %1471 = vrsqrt.f32 %v417_v60  ;;  %vm425_vm13 = vweird.f32 %v417_v60 }
 0x50a   :  { %v414_v0 = vpop.xlane.xlu2 %413 }
 0x50b   :  { %v416_v1 = vmul.f32 %v414_v0, %v1724_v14 }
 0x50d   :  { %v1472_v3 = vpop.eup %1471  ;;  %v418_v4 = vadd.f32 1e-05, %v416_v1 }
 0x50e   :  { %v420_v6 = vmul.f32 %v1472_v3, %v417_v60  ;;  %vm426_vm12 = vweird.f32 %v1472_v3 }
 0x50f   :  { %1473 = vrsqrt.f32 %v418_v4  ;;  %vm427_vm14 = vmor %vm425_vm13, %vm426_vm12  ;;  %vm435_vm3 = vweird.f32 %v418_v4 }
 0x510   :  { %v421_v8 = vmul.f32 %v1472_v3, %v420_v6  ;;  %v1357_v6 = vld [vmem:[%s2098_s4 + $0x60] sm:$0xff] }
 0x512   :  { %v422_v10 = vmul.f32 0.5, %v421_v8  ;;  %v1355_v8 = vld [vmem:[%s2098_s4 + $0x50] sm:$0xff] }
 0x514   :  { %v423_v12 = vsub.f32 1.5, %v422_v10  ;;  %v1353_v10 = vld [vmem:[%s2098_s4 + $0x40] sm:$0xff] }
 0x515   :  { %v1474_v13 = vpop.eup %1473 }
 0x516   :  { %v424_v16 = vmul.f32 %v1472_v3, %v423_v12  ;;  %v430_v18 = vmul.f32 %v1474_v13, %v418_v4  ;;  %vm436_vm15 = vweird.f32 %v1474_v13  ;;  %v1359_v4 = vld [vmem:[%s2098_s4 + $0x70] sm:$0xff] }
 0x517   :  { %vm437_vm4 = vmor %vm435_vm3, %vm436_vm15  ;;  %604 = vmatpush.msra.mxu2 %v1359_v4 }
 0x518   :  { %v428_v21 = vsel %vm427_vm14, %v1472_v3, %v424_v16  ;;  %v431_v22 = vmul.f32 %v1474_v13, %v430_v18 }
 0x519   :  { %v439_v23 = vmul.f32 %v428_v21, %v405_v46  ;;  %605 = vmatpush.msra.mxu2 %v1357_v6 }
 0x51a   :  { %v432_v26 = vmul.f32 0.5, %v431_v22 }
 0x51b   :  { %v442_v28 = vmul.f32 %v441_v19, %v439_v23  ;;  %606 = vmatpush.msra.mxu2 %v1355_v8 }
 0x51c   :  { %v433_v30 = vsub.f32 1.5, %v432_v26 }
 0x51d   :  { %v445_v31 = vadd.f32 %v444_v24, %v442_v28  ;;  %607 = vmatpush.msra.mxu2 %v1353_v10 }
 0x51e   :  { %v434_v33 = vmul.f32 %v1474_v13, %v433_v30 }
 0x51f   :  { %1350 = vmatmul.msk.f32.vlgmr.msra.gmra.mxu0 %vm107_vm1, %v445_v31 }
 0x520   :  { %v438_v34 = vsel %vm437_vm4, %v1474_v13, %v434_v33  ;;  %v572_v33 = vperm.slane %v1717_v27, 4 }
 0x521   :  { %v440_v35 = vmul.f32 %v438_v34, %v1729_v51 }
 0x523   :  { %v443_v36 = vmul.f32 %v441_v19, %v440_v35 }
 0x525   :  { %v446_v37 = vadd.f32 %v444_v24, %v443_v36 }
 0x527   :  { %1351 = vmatmul.msk.f32.gmra.mxu0 %vm107_vm1, %v446_v37 }
 0x59c   :  { %v475_v43 = vpop.f32.mrf.mxu0 }
 0x59d   :  { %v476_v44 = vadd.f32 %v475_v43, %v451_v42 }
 0x59f   :  { %v481_v45 = vmax.f32 %v476_v44, 0.0 }
 0x5a1   :  { %516 = vmatmul.f32.vlgmr.msra.gmra.mxu1 %v481_v45 }
 0x5a4   :  { %v478_v46 = vpop.f32.mrf.mxu0 }
 0x5a5   :  { %v479_v47 = vadd.f32 %v478_v46, %v451_v42 }
 0x5a7   :  { %v482_v17 = vmax.f32 %v479_v47, 0.0 }
 0x5a9   :  { %519 = vmatmul.f32.gmra.mxu1 %v482_v17 }
 0x61e   :  { %v517_v50 = vpop.f32.mrf.mxu1 }
 0x61f   :  { %v518_v51 = vadd.f32 %v517_v50, %v499_v49 }
 0x621   :  { %v523_v52 = vadd.f32 %v518_v51, %v445_v31 }
 0x623   :  { %v525_v53 = vsel %vm107_vm1, %v523_v52, 0.0 }
 0x624   :  { %526 = vadd.xlane.f32.xlu1 %v525_v53 }
 0x626   :  { %v520_v54 = vpop.f32.mrf.mxu1 }
 0x627   :  { %v521_v55 = vadd.f32 %v520_v54, %v499_v49 }
 0x629   :  { %v524_v56 = vadd.f32 %v521_v55, %v446_v37 }
 0x62b   :  { %v528_v57 = vsel %vm392_vm10, %v524_v56, 0.0 }
 0x62c   :  { %529 = vadd.xlane.f32.xlu1 %v528_v57 }
 0x697   :  { %v527_v58 = vpop.xlane.xlu1 %526 }
 0x698   :  { %v531_v59 = vmul.f32 %v527_v58, %v1724_v14 }
 0x69a   :  { %v533_v60 = vsub.f32 %v523_v52, %v531_v59 }
 0x69c   :  { %v535_v61 = vmul.f32 %v533_v60, %v533_v60 }
 0x69e   :  { %v537_v62 = vsel %vm107_vm1, %v535_v61, 0.0 }
 0x69f   :  { %538 = vadd.xlane.f32.xlu1 %v537_v62  ;;  %v530_v63 = vpop.xlane.xlu1 %529 }
 0x6a0   :  { %v532_v0 = vmul.f32 %v530_v63, %v1724_v14 }
 0x6a2   :  { %v534_v1 = vsub.f32 %v524_v56, %v532_v0 }
 0x6a4   :  { %v536_v2 = vmul.f32 %v534_v1, %v534_v1 }
 0x6a6   :  { %v540_v3 = vsel %vm392_vm10, %v536_v2, 0.0 }
 0x6a7   :  { %541 = vadd.xlane.f32.xlu1 %v540_v3 }
 0x712   :  { %v539_v12 = vpop.xlane.xlu1 %538 }
 0x713   :  { %v543_v13 = vmul.f32 %v539_v12, %v1724_v14 }
 0x715   :  { %v545_v15 = vadd.f32 1e-05, %v543_v13 }
 0x717   :  { %1475 = vrsqrt.f32 %v545_v15  ;;  %vm553_vm7 = vweird.f32 %v545_v15 }
 0x71a   :  { %v542_v16 = vpop.xlane.xlu1 %541 }
 0x71b   :  { %v544_v18 = vmul.f32 %v542_v16, %v1724_v14 }
 0x71d   :  { %v1476_v19 = vpop.eup %1475  ;;  %v546_v20 = vadd.f32 1e-05, %v544_v18 }
 0x71e   :  { %v548_v21 = vmul.f32 %v1476_v19, %v545_v15  ;;  %vm554_vm5 = vweird.f32 %v1476_v19 }
 0x71f   :  { %1477 = vrsqrt.f32 %v546_v20  ;;  %vm555_vm11 = vmor %vm553_vm7, %vm554_vm5  ;;  %vm563_vm13 = vweird.f32 %v546_v20 }
 0x720   :  { %v549_v22 = vmul.f32 %v1476_v19, %v548_v21 }
 0x722   :  { %v550_v23 = vmul.f32 0.5, %v549_v22 }
 0x724   :  { %v551_v24 = vsub.f32 1.5, %v550_v23 }
 0x725   :  { %v1478_v25 = vpop.eup %1477 }
 0x726   :  { %v552_v26 = vmul.f32 %v1476_v19, %v551_v24  ;;  %v558_v28 = vmul.f32 %v1478_v25, %v546_v20  ;;  %vm564_vm12 = vweird.f32 %v1478_v25 }
 0x727   :  { %vm565_vm14 = vmor %vm563_vm13, %vm564_vm12 }
 0x728   :  { %v556_v30 = vsel %vm555_vm11, %v1476_v19, %v552_v26  ;;  %v559_v31 = vmul.f32 %v1478_v25, %v558_v28  ;;  %v1386_v28 = vld [vmem:[%s2100_s5 + $0x78] sm:$0xff] }
 0x729   :  { %v567_v32 = vmul.f32 %v556_v30, %v533_v60  ;;  %847 = vmatpush.msrb.mxu1 %v1386_v28  ;;  %v1384_v30 = vld [vmem:[%s2100_s5 + $0x68] sm:$0xff] }
 0x72a   :  { %v560_v34 = vmul.f32 0.5, %v559_v31  ;;  %v1383_v31 = vld [vmem:[%s2100_s5 + $0x60] sm:$0xff] }
 0x72b   :  { %v570_v35 = vmul.f32 %v569_v29, %v567_v32  ;;  %v1382_v32 = vld [vmem:[%s2100_s5 + $0x58] sm:$0xff] }
 0x72c   :  { %v561_v36 = vsub.f32 1.5, %v560_v34  ;;  %v1380_v34 = vld [vmem:[%s2100_s5 + $0x48] sm:$0xff] }
 0x72d   :  { %v1837_v37 = vadd.f32 %v572_v33, %v570_v35  ;;  %v1379_v35 = vld [vmem:[%s2100_s5 + $0x40] sm:$0xff] }
 0x72e   :  { %v562_v38 = vmul.f32 %v1478_v25, %v561_v36 }
 0x72f   :  { %1361 = vmatmul.msk.f32.vlgmr.msra.gmra.mxu2 %vm107_vm1, %v1837_v37  ;;  %1363 = vmatmul.msk.f32.vlgmr.msra.gmra.mxu3 %vm107_vm1, %v1837_v37 }
 0x730   :  { %v566_v40 = vsel %vm565_vm14, %v1478_v25, %v562_v38 }
 0x731   :  { %v568_v41 = vmul.f32 %v566_v40, %v534_v1 }
 0x733   :  { %v571_v42 = vmul.f32 %v569_v29, %v568_v41  ;;  %v1385_v29 = vld [vmem:[%s2100_s5 + $0x70] sm:$0xff] }
 0x734   :  { %848 = vmatpush.msrb.mxu1 %v1385_v29 }
 0x735   :  { %v1843_v43 = vadd.f32 %v572_v33, %v571_v42  ;;  %v1381_v33 = vld [vmem:[%s2100_s5 + $0x50] sm:$0xff] }
 0x736   :  { %849 = vmatpush.msrb.mxu1 %v1384_v30 }
 0x737   :  { %1362 = vmatmul.msk.f32.gmra.mxu2 %vm107_vm1, %v1843_v43  ;;  %1364 = vmatmul.msk.f32.gmra.mxu3 %vm107_vm1, %v1843_v43 }
 0x738   :  { %850 = vmatpush.msrb.mxu1 %v1383_v31 }
 0x73a   :  { %851 = vmatpush.msrb.mxu1 %v1382_v32  ;;  %v1400_v32 = vld [vmem:[%s2103_s7 + $0xa8] sm:$0xff] }
 0x73c   :  { %852 = vmatpush.msrb.mxu1 %v1381_v33 }
 0x73e   :  { %853 = vmatpush.msrb.mxu1 %v1380_v34 }
 0x740   :  { %854 = vmatpush.msrb.mxu1 %v1379_v35  ;;  %v1399_v35 = vld [vmem:[%s2103_s7 + $0xa0] sm:$0xff] }
 0x7b2   :  { %v609_v27 = vpop.f32.mrf.mxu2  ;;  %v632_v44 = vpop.f32.mrf.mxu3 }
 0x7b3   :  { %v638_v45 = vmul.f32 0.4204482, %v609_v27 }
 0x7b5   :  { %723 = vrot.lane.b32.xlu2 %v638_v45, %s1507_s23  ;;  %727 = vrot.lane.b32.xlu1 %v638_v45, %s1509_s1 }
 0x7ba   :  { %v612_v46 = vpop.f32.mrf.mxu2  ;;  %v635_v47 = vpop.f32.mrf.mxu3 }
 0x7bb   :  { %v639_v17 = vmul.f32 0.4204482, %v612_v46  ;;  %1369 = vmatpush.msk.msrb.mxu2 %vm221_vm2, %v635_v47 }
 0x7bd   :  { %715 = vmatpush.msrb.mxu2 %v632_v44  ;;  %644 = vrot.lane.b32.xlu1 %v639_v17, %s1508_s24 }
 0x7be   :  { %729 = vrot.lane.b32.xlu0 %v639_v17, %s1509_s1 }
 0x7c5   :  { %779 = vrot.lane.b32.xlu1 %v635_v47, %s1507_s23 }
 0x7c6   :  { %725 = vrot.lane.b32.xlu0 %v639_v17, %s1507_s23 }
 0x7cd   :  { %777 = vrot.lane.b32.xlu1 %v632_v44, %s1507_s23  ;;  %v1912_v44 = vld [vmem:[%s2101_s8 + $0x8] sm:$0xff] }
 0x7ce   :  { %642 = vrot.lane.b32.xlu0 %v638_v45, %s1508_s24  ;;  %v911_v31 = vperm.slane %v1912_v44, 2 }
 0x80f   :  { %v724_v52 = vpop.permute.xlu2 %723 }
 0x827   :  { %v728_v49 = vpop.permute.xlu1 %727 }
 0x82f   :  { %v645_v50 = vpop.permute.xlu1 %644 }
 0x830   :  { %v730_v51 = vpop.permute.xlu0 %729  ;;  %1365 = vmatpush.xpose.msk.msrb.mxu0 %vm107_vm1, %v645_v50 }
 0x831   :  { %1372 = vmatpush.xpose.msk.msrb.mxu3 %vm107_vm1, %v730_v51 }
 0x835   :  { %1373 = vmatpush.xpose.msk.msrb.mxu3 %vm107_vm1, %v728_v49 }
 0x837   :  { %v780_v54 = vpop.permute.xlu1 %779 }
 0x838   :  { %v726_v53 = vpop.permute.xlu0 %725  ;;  %1374 = vmatmul.msk.f32.vlgmr.msrb.gmra.mxu3 %vm107_vm1, %v724_v52 }
 0x83f   :  { %v778_v56 = vpop.permute.xlu1 %777 }
 0x840   :  { %v643_v55 = vpop.permute.xlu0 %642  ;;  %1375 = vmatmul.msk.f32.gmra.mxu3 %vm107_vm1, %v726_v53 }
 0x841   :  { %1366 = vmatpush.xpose.msk.msrb.mxu0 %vm107_vm1, %v643_v55 }
 0x844   :  { %1367 = vmatmul.msk.f32.vlgmr.msrb.gmra.mxu0 %vm107_vm1, %v638_v45  ;;  %v832_v45 = vperm.slane %v1912_v44, 0 }
 0x845   :  { %1376 = vmatpush.msk.msra.mxu0 %vm221_vm2, %v780_v54 }
 0x847   :  { %805 = vmatpush.msra.mxu0 %v778_v56 }
 0x84c   :  { %1368 = vmatmul.msk.f32.gmra.mxu0 %vm107_vm1, %v639_v17 }
 0x8bb   :  { %v756_v57 = vpop.f32.mrf.mxu3 }
 0x8bc   :  { %v757_v58 = vadd.f32 %v756_v57, %v1668_v39 }
 0x8be   :  { %v762_v59 = vmul.f32 1.442695, %v757_v58 }
 0x8c0   :  { %1479 = vpow2.f32 %v762_v59 }
 0x8c1   :  { %v671_v60 = vpop.f32.mrf.mxu0 }
 0x8c2   :  { %v672_v61 = vadd.f32 %v671_v60, %v1668_v39 }
 0x8c3   :  { %v759_v62 = vpop.f32.mrf.mxu3 }
 0x8c4   :  { %v677_v63 = vmul.f32 1.442695, %v672_v61  ;;  %v760_v0 = vadd.f32 %v759_v62, %v1673_v48  ;;  %v1392_v62 = vld [vmem:[%s2102_s6 + $0x38] sm:$0xff] }
 0x8c5   :  { %938 = vmatpush.msra.mxu2 %v1392_v62 }
 0x8c6   :  { %v1480_v1 = vpop.eup %1479  ;;  %1481 = vpow2.f32 %v677_v63  ;;  %v764_v2 = vmul.f32 1.442695, %v760_v0  ;;  %v1391_v63 = vld [vmem:[%s2102_s6 + $0x30] sm:$0xff]  ;;  %v1390_v0 = vld [vmem:[%s2102_s6 + $0x28] sm:$0xff] }
 0x8c7   :  { %v766_v3 = vsel %vm203_vm6, %v1480_v1, 0.0  ;;  %939 = vmatpush.msra.mxu2 %v1391_v63 }
 0x8c8   :  { %1483 = vpow2.f32 %v764_v2  ;;  %767 = vadd.xlane.f32.xlu2 %v766_v3 }
 0x8c9   :  { %v674_v4 = vpop.f32.mrf.mxu0  ;;  %940 = vmatpush.msra.mxu2 %v1390_v0 }
 0x8ca   :  { %v675_v5 = vadd.f32 %v674_v4, %v1673_v48 }
 0x8cc   :  { %v1482_v6 = vpop.eup %1481  ;;  %v679_v7 = vmul.f32 1.442695, %v675_v5  ;;  %v1410_v5 = vld [vmem:[%s2103_s7 + $0xf8] sm:$0xff] }
 0x8cd   :  { %v681_v8 = vsel %vm203_vm6, %v1482_v6, 0.0  ;;  %969 = vmatpush.msra.mxu3 %v1410_v5 }
 0x8ce   :  { %v1484_v9 = vpop.eup %1483  ;;  %1485 = vpow2.f32 %v679_v7  ;;  %682 = vadd.xlane.f32.xlu1 %v681_v8  ;;  %v1408_v7 = vld [vmem:[%s2103_s7 + $0xe8] sm:$0xff] }
 0x8cf   :  { %v769_v39 = vsel %vm207_vm8, %v1484_v9, 0.0 }
 0x8d0   :  { %770 = vadd.xlane.f32.xlu0 %v769_v39  ;;  %v1407_v39 = vld [vmem:[%s2103_s7 + $0xe0] sm:$0xff] }
 0x8d4   :  { %v1486_v10 = vpop.eup %1485 }
 0x8d5   :  { %v684_v11 = vsel %vm207_vm8, %v1486_v10, 0.0 }
 0x8d6   :  { %685 = vadd.xlane.f32.xlu2 %v684_v11 }
 0x93b   :  { %v768_v12 = vpop.xlane.xlu2 %767 }
 0x93c   :  { %1487 = vrcp.f32 %v768_v12  ;;  %v1406_v12 = vld [vmem:[%s2103_s7 + $0xd8] sm:$0xff] }
 0x941   :  { %v683_v13 = vpop.xlane.xlu1 %682 }
 0x942   :  { %v1488_v15 = vpop.eup %1487  ;;  %1489 = vrcp.f32 %v683_v13 }
 0x943   :  { %v774_v48 = vmul.f32 %v1488_v15, %v1480_v1  ;;  %v771_v16 = vpop.xlane.xlu0 %770  ;;  %v1389_v1 = vld [vmem:[%s2102_s6 + $0x20] sm:$0xff]  ;;  %v1405_v15 = vld [vmem:[%s2103_s7 + $0xd0] sm:$0xff] }
 0x944   :  { %1491 = vrcp.f32 %v771_v16  ;;  %941 = vmatpush.msra.mxu2 %v1389_v1  ;;  %v1404_v16 = vld [vmem:[%s2103_s7 + $0xc8] sm:$0xff] }
 0x945   :  { %1377 = vmatmul.msk.f32.vlgmr.msra.gmra.mxu0 %vm203_vm6, %v774_v48 }
 0x948   :  { %v1490_v18 = vpop.eup %1489 }
 0x949   :  { %v689_v19 = vmul.f32 %v1490_v18, %v1482_v6  ;;  %v686_v20 = vpop.xlane.xlu2 %685  ;;  %v1409_v6 = vld [vmem:[%s2103_s7 + $0xf0] sm:$0xff] }
 0x94a   :  { %v1492_v21 = vpop.eup %1491  ;;  %1493 = vrcp.f32 %v686_v20  ;;  %970 = vmatpush.msra.mxu3 %v1409_v6 }
 0x94b   :  { %1370 = vmatmul.msk.f32.vlgmr.msrb.gmra.mxu2 %vm203_vm6, %v689_v19  ;;  %v775_v22 = vmul.f32 %v1492_v21, %v1484_v9  ;;  %v1403_v19 = vld [vmem:[%s2103_s7 + $0xc0] sm:$0xff] }
 0x94c   :  { %971 = vmatpush.msra.mxu3 %v1408_v7 }
 0x94d   :  { %1378 = vmatmul.msk.f32.gmra.mxu0 %vm203_vm6, %v775_v22  ;;  %v1402_v22 = vld [vmem:[%s2103_s7 + $0xb8] sm:$0xff] }
 0x94e   :  { %972 = vmatpush.msra.mxu3 %v1407_v39 }
 0x950   :  { %v1494_v23 = vpop.eup %1493  ;;  %973 = vmatpush.msra.mxu3 %v1406_v12 }
 0x951   :  { %v690_v24 = vmul.f32 %v1494_v23, %v1486_v10 }
 0x952   :  { %974 = vmatpush.msra.mxu3 %v1405_v15 }
 0x953   :  { %1371 = vmatmul.msk.f32.gmra.mxu2 %vm203_vm6, %v690_v24 }
 0x954   :  { %975 = vmatpush.msra.mxu3 %v1404_v16 }
 0x956   :  { %976 = vmatpush.msra.mxu3 %v1403_v19  ;;  %v1047_v19 = vld [vmem:[%s2104_s10 + $0x18] sm:$0xff] }
 0x957   :  { %1092 = vmatpush.msra.mxu1 %v1047_v19 }
 0x958   :  { %977 = vmatpush.msra.mxu3 %v1402_v22 }
 0x9c2   :  { %v807_v25 = vpop.f32.mrf.mxu0 }
 0x9c3   :  { %815 = vrot.lane.b32.xlu0 %v807_v25, %s1509_s1  ;;  %v908_v25 = vperm.slane %v1912_v44, 1 }
 0x9ca   :  { %v810_v26 = vpop.f32.mrf.mxu0 }
 0x9cb   :  { %817 = vrot.lane.b32.xlu2 %v810_v26, %s1509_s1  ;;  %v1401_v26 = vld [vmem:[%s2103_s7 + $0xb0] sm:$0xff] }
 0x9cc   :  { %978 = vmatpush.msra.mxu3 %v1401_v26 }
 0x9ce   :  { %v717_v36 = vpop.f32.mrf.mxu2  ;;  %979 = vmatpush.msra.mxu3 %v1400_v32  ;;  %v1041_v32 = vperm.slane %v1912_v44, 4 }
 0x9d0   :  { %980 = vmatpush.msra.mxu3 %v1399_v35 }
 0x9d6   :  { %v720_v42 = vpop.f32.mrf.mxu2 }
 0xa25   :  { %v818_v41 = vpop.permute.xlu2 %817 }
 0xa26   :  { %v822_v27 = vsel %vm107_vm1, %v720_v42, %v818_v41 }
 0xa35   :  { %v816_v38 = vpop.permute.xlu0 %815 }
 0xa36   :  { %v821_v40 = vsel %vm107_vm1, %v717_v36, %v816_v38 }
 0xa37   :  { %1387 = vmatmul.msk.f32.vlgmr.msrb.gmra.mxu1 %vm357_vm9, %v821_v40  ;;  %v1398_v40 = vld [vmem:[%s2103_s7 + $0x98] sm:$0xff] }
 0xa38   :  { %981 = vmatpush.msra.mxu3 %v1398_v40 }
 0xa3f   :  { %1388 = vmatmul.msk.f32.gmra.mxu1 %vm357_vm9, %v822_v27 }
 0xab4   :  { %v856_v46 = vpop.f32.mrf.mxu1 }
 0xab5   :  { %v857_v47 = vadd.f32 %v856_v46, %v832_v45 }
 0xab7   :  { %v862_v17 = vadd.f32 %v857_v47, %v1837_v37  ;;  %v1397_v47 = vld [vmem:[%s2103_s7 + $0x90] sm:$0xff] }
 0xab8   :  { %982 = vmatpush.msra.mxu3 %v1397_v47  ;;  %v1044_v47 = vld [vmem:[%s2104_s10] sm:$0xff] }
 0xab9   :  { %v864_v49 = vsel %vm107_vm1, %v862_v17, 0.0 }
 0xaba   :  { %865 = vadd.xlane.f32.xlu1 %v864_v49  ;;  %v1395_v49 = vld [vmem:[%s2103_s7 + $0x80] sm:$0xff] }
 0xabc   :  { %v859_v50 = vpop.f32.mrf.mxu1 }
 0xabd   :  { %v860_v51 = vadd.f32 %v859_v50, %v832_v45  ;;  %v919_v50 = vperm.slane %v1912_v44, 6 }
 0xabf   :  { %v863_v52 = vadd.f32 %v860_v51, %v1843_v43 }
 0xac1   :  { %v867_v53 = vsel %vm392_vm10, %v863_v52, 0.0 }
 0xac2   :  { %868 = vadd.xlane.f32.xlu0 %v867_v53 }
 0xb2d   :  { %v866_v54 = vpop.xlane.xlu1 %865 }
 0xb2e   :  { %v870_v55 = vmul.f32 %v866_v54, %v1724_v14 }
 0xb30   :  { %v872_v56 = vsub.f32 %v862_v17, %v870_v55  ;;  %v1396_v17 = vld [vmem:[%s2103_s7 + $0x88] sm:$0xff] }
 0xb31   :  { %983 = vmatpush.msra.mxu3 %v1396_v17  ;;  %v1100_v17 = vld [vmem:[%s2108_s2] sm:$0x3] }
 0xb32   :  { %v874_v57 = vmul.f32 %v872_v56, %v872_v56  ;;  %1102 = vrot.lane.b32.xlu0 %v1100_v17, %s1509_s1 }
 0xb33   :  { %984 = vmatpush.msra.mxu3 %v1395_v49  ;;  %v1110_v49 = vld [vmem:[%s2109_s11 + $0x20] sm:$0xf] }
 0xb34   :  { %v876_v58 = vsel %vm107_vm1, %v874_v57, 0.0 }
 0xb35   :  { %877 = vadd.xlane.f32.xlu1 %v876_v58  ;;  %v869_v59 = vpop.xlane.xlu0 %868  ;;  %v968_v58 = vperm.slane %v1912_v44, 5 }
 0xb36   :  { %v871_v37 = vmul.f32 %v869_v59, %v1724_v14 }
 0xb38   :  { %v1922_v60 = vsub.f32 %v863_v52, %v871_v37 }
 0xb3a   :  { %v875_v61 = vmul.f32 %v1922_v60, %v1922_v60 }
 0xb3c   :  { %v879_v43 = vsel %vm392_vm10, %v875_v61, 0.0 }
 0xb3d   :  { %880 = vadd.xlane.f32.xlu2 %v879_v43 }
 0xba8   :  { %v878_v2 = vpop.xlane.xlu1 %877 }
 0xba9   :  { %v882_v3 = vmul.f32 %v878_v2, %v1724_v14 }
 0xbab   :  { %v884_v4 = vadd.f32 1e-05, %v882_v3 }
 0xbad   :  { %1495 = vrsqrt.f32 %v884_v4  ;;  %vm892_vm9 = vweird.f32 %v884_v4 }
 0xbb0   :  { %v881_v8 = vpop.xlane.xlu2 %880 }
 0xbb1   :  { %v883_v9 = vmul.f32 %v881_v8, %v1724_v14 }
 0xbb3   :  { %v1496_v10 = vpop.eup %1495  ;;  %v885_v11 = vadd.f32 1e-05, %v883_v9 }
 0xbb4   :  { %v887_v13 = vmul.f32 %v1496_v10, %v884_v4  ;;  %vm893_vm8 = vweird.f32 %v1496_v10 }
 0xbb5   :  { %1497 = vrsqrt.f32 %v885_v11  ;;  %vm894_vm15 = vmor %vm892_vm9, %vm893_vm8  ;;  %vm902_vm4 = vweird.f32 %v885_v11  ;;  %vm1173_vm8 = vcmask 25600   ;;  %vm1290_vm9 = vcmask 1040384  }
 0xbb6   :  { %v888_v48 = vmul.f32 %v1496_v10, %v887_v13 }
 0xbb8   :  { %v889_v18 = vmul.f32 0.5, %v888_v48 }
 0xbba   :  { %v890_v20 = vsub.f32 1.5, %v889_v18 }
 0xbbb   :  { %v1498_v21 = vpop.eup %1497 }
 0xbbc   :  { %v891_v23 = vmul.f32 %v1496_v10, %v890_v20  ;;  %v897_v24 = vmul.f32 %v1498_v21, %v885_v11  ;;  %vm903_vm3 = vweird.f32 %v1498_v21  ;;  %v1046_v20 = vld [vmem:[%s2104_s10 + $0x10] sm:$0xff] }
 0xbbd   :  { %vm904_vm5 = vmor %vm902_vm4, %vm903_vm3  ;;  %1093 = vmatpush.msra.mxu1 %v1046_v20  ;;  %vm1320_vm3 = vcmask 367616  }
 0xbbe   :  { %v895_v28 = vsel %vm894_vm15, %v1496_v10, %v891_v23  ;;  %v898_v29 = vmul.f32 %v1498_v21, %v897_v24  ;;  %vm1318_vm15 = vcmask 343040  }
 0xbbf   :  { %v906_v30 = vmul.f32 %v895_v28, %v872_v56  ;;  %v1038_v28 = vperm.slane %v1912_v44, 3  ;;  %v1143_v44 = vld [vmem:[%s2106_s12 + $0x8] sm:$0xff] }
 0xbc0   :  { %v899_v33 = vmul.f32 0.5, %v898_v29 }
 0xbc1   :  { %v909_v34 = vmul.f32 %v908_v25, %v906_v30 }
 0xbc2   :  { %v900_v36 = vsub.f32 1.5, %v899_v33 }
 0xbc3   :  { %v912_v38 = vadd.f32 %v911_v31, %v909_v34 }
 0xbc4   :  { %v901_v41 = vmul.f32 %v1498_v21, %v900_v36 }
 0xbc5   :  { %1393 = vmatmul.msk.f32.vlgmr.msra.gmra.mxu2 %vm107_vm1, %v912_v38 }
 0xbc6   :  { %v905_v42 = vsel %vm904_vm5, %v1498_v21, %v901_v41  ;;  %v1437_v21 = vpack.i.bf16 %v1046_v20, %v1047_v19 }
 0xbc7   :  { %v907_v27 = vmul.f32 %v905_v42, %v1922_v60 }
 0xbc8   :  { %1438 = vrot.lane.b32.xlu0 %v1437_v21, %s1507_s23 }
 0xbc9   :  { %v910_v45 = vmul.f32 %v908_v25, %v907_v27 }
 0xbcb   :  { %v913_v46 = vadd.f32 %v911_v31, %v910_v45  ;;  %v1049_v45 = vld [vmem:[%s2105_s9] sm:$0xf] }
 0xbcd   :  { %1394 = vmatmul.msk.f32.gmra.mxu2 %vm107_vm1, %v913_v46 }
 0xc48   :  { %v943_v51 = vpop.f32.mrf.mxu2 }
 0xc49   :  { %v944_v52 = vadd.f32 %v943_v51, %v919_v50  ;;  %v1108_v51 = vld [vmem:[%s2109_s11 + $0x10] sm:$0xff] }
 0xc4b   :  { %v949_v53 = vmax.f32 %v944_v52, 0.0 }
 0xc4d   :  { %985 = vmatmul.f32.vlgmr.msra.gmra.mxu3 %v949_v53  ;;  %v1107_v53 = vld [vmem:[%s2109_s11 + $0x8] sm:$0xff] }
 0xc50   :  { %v946_v54 = vpop.f32.mrf.mxu2 }
 0xc51   :  { %v947_v55 = vadd.f32 %v946_v54, %v919_v50  ;;  %v1109_v50 = vld [vmem:[%s2109_s11 + $0x18] sm:$0xff]  ;;  %v1106_v54 = vld [vmem:[%s2109_s11] sm:$0xff] }
 0xc53   :  { %v950_v56 = vmax.f32 %v947_v55, 0.0  ;;  %v1449_v55 = vld [vmem:[%s2107_s13] ss:$0 sm:$0xff] }
 0xc55   :  { %988 = vmatmul.f32.gmra.mxu3 %v950_v56 }
 0xcd0   :  { %v986_v57 = vpop.f32.mrf.mxu3 }
 0xcd1   :  { %v987_v61 = vadd.f32 %v986_v57, %v968_v58  ;;  %v1103_v57 = vpop.permute.xlu0 %1102 }
 0xcd3   :  { %v992_v62 = vadd.f32 %v987_v61, %v912_v38 }
 0xcd5   :  { %v994_v63 = vsel %vm107_vm1, %v992_v62, 0.0 }
 0xcd8   :  { %v989_v59 = vpop.f32.mrf.mxu3 }
 0xcd9   :  { %v990_v37 = vadd.f32 %v989_v59, %v968_v58 }
 0xcdb   :  { %v993_v60 = vadd.f32 %v990_v37, %v913_v46  ;;  %v1142_v46 = vld [vmem:[%s2106_s12] sm:$0xff] }
 0xcdc   :  { %v1450_v37 = vld [vmem:[%s2107_s13 + $0x1] ss:$0 sm:$0xff] }
 0xcdd   :  { %v997_v43 = vsel %vm392_vm10, %v993_v60, 0.0 }
 0xcde   :  { %998 = vadd.xlane.f32.xlu1 %v997_v43 }
 0xce6   :  { %995 = vadd.xlane.f32.xlu1 %v994_v63 }
 0xd51   :  { %v999_v0 = vpop.xlane.xlu1 %998 }
 0xd52   :  { %v1001_v1 = vmul.f32 %v999_v0, %v1724_v14 }
 0xd54   :  { %v1003_v2 = vsub.f32 %v993_v60, %v1001_v1 }
 0xd56   :  { %v1005_v3 = vmul.f32 %v1003_v2, %v1003_v2 }
 0xd58   :  { %v1009_v4 = vsel %vm392_vm10, %v1005_v3, 0.0 }
 0xd59   :  { %1010 = vadd.xlane.f32.xlu1 %v1009_v4  ;;  %v996_v5 = vpop.xlane.xlu1 %995  ;;  %v1186_v4 = vld [vmem:[%s2107_s13 + $0x4] sm:$0x1] }
 0xd5a   :  { %v1000_v6 = vmul.f32 %v996_v5, %v1724_v14 }
 0xd5c   :  { %v1002_v7 = vsub.f32 %v992_v62, %v1000_v6  ;;  %v1451_v62 = vld [vmem:[%s2107_s13 + $0x2] ss:$0 sm:$0xff] }
 0xd5e   :  { %v1004_v8 = vmul.f32 %v1002_v7, %v1002_v7 }
 0xd60   :  { %v1006_v9 = vsel %vm107_vm1, %v1004_v8, 0.0  ;;  %v1185_v8 = vld [vmem:[%s2107_s13 + $0x3] sm:$0x1] }
 0xd61   :  { %1007 = vadd.xlane.f32.xlu1 %v1006_v9 }
 0xd7a   :  { %1169 = vrot.lane.b32.xlu1 %v1100_v17, %s1513_s17 }
 0xd82   :  { %1293 = vrot.lane.b32.xlu1 %v1185_v8, %s1514_s20 }
 0xdcc   :  { %v1011_v39 = vpop.xlane.xlu1 %1010 }
 0xdcd   :  { %v1013_v10 = vmul.f32 %v1011_v39, %v1724_v14 }
 0xdcf   :  { %v1015_v11 = vadd.f32 1e-05, %v1013_v10 }
 0xdd1   :  { %1499 = vrsqrt.f32 %v1015_v11  ;;  %vm1032_vm7 = vweird.f32 %v1015_v11 }
 0xdd4   :  { %v1008_v12 = vpop.xlane.xlu1 %1007 }
 0xdd5   :  { %v1012_v13 = vmul.f32 %v1008_v12, %v1724_v14  ;;  %v2013_v14 = vld [vmem:[%s2104_s10 + $0x8] sm:$0xff] }
 0xdd6   :  { %1094 = vmatpush.msra.mxu1 %v2013_v14  ;;  %v1442_v10 = vpack.i.bf16 %v1044_v47, %v2013_v14 }
 0xdd7   :  { %v1500_v15 = vpop.eup %1499  ;;  %v1014_v48 = vadd.f32 1e-05, %v1012_v13  ;;  %v1439_v13 = vpop.permute.xlu0 %1438 }
 0xdd8   :  { %v1027_v16 = vmul.f32 %v1500_v15, %v1015_v11  ;;  %vm1033_vm10 = vweird.f32 %v1500_v15  ;;  %1095 = vmatpush.msra.mxu1 %v1044_v47 }
 0xdd9   :  { %1501 = vrsqrt.f32 %v1014_v48  ;;  %vm1034_vm11 = vmor %vm1032_vm7, %vm1033_vm10  ;;  %vm1022_vm13 = vweird.f32 %v1014_v48 }
 0xdda   :  { %v1028_v18 = vmul.f32 %v1500_v15, %v1027_v16  ;;  %v1187_v16 = vld [vmem:[%s2107_s13 + $0x8] sm:$0xf] }
 0xddc   :  { %v1029_v22 = vmul.f32 0.5, %v1028_v18 }
 0xdde   :  { %v1030_v23 = vsub.f32 1.5, %v1029_v22 }
 0xddf   :  { %v1502_v24 = vpop.eup %1501 }
 0xde0   :  { %v1031_v25 = vmul.f32 %v1500_v15, %v1030_v23  ;;  %v1017_v26 = vmul.f32 %v1502_v24, %v1014_v48  ;;  %vm1023_vm12 = vweird.f32 %v1502_v24  ;;  %v1440_v48 = vunpack.i.l.bf16 %v1439_v13 }
 0xde1   :  { %vm1024_vm14 = vmor %vm1022_vm13, %vm1023_vm12 }
 0xde2   :  { %v1035_v29 = vsel %vm1034_vm11, %v1500_v15, %v1031_v25  ;;  %v1018_v30 = vmul.f32 %v1502_v24, %v1017_v26  ;;  %v1441_v15 = vunpack.i.h.bf16 %v1439_v13  ;;  %v1516_v25 = vmov 6  }
 0xde3   :  { %v1037_v31 = vmul.f32 %v1035_v29, %v1003_v2  ;;  %1447 = vset.pattern.permute.xlu1 %v1516_v25  ;;  %1448 = vset.pattern.permute.xlu0 %v1516_v25 }
 0xde4   :  { %v1019_v33 = vmul.f32 0.5, %v1018_v30 }
 0xde5   :  { %v1040_v34 = vmul.f32 %v1038_v28, %v1037_v31 }
 0xde6   :  { %v1020_v35 = vsub.f32 1.5, %v1019_v33 }
 0xde7   :  { %v1043_v36 = vadd.f32 %v1041_v32, %v1040_v34 }
 0xde8   :  { %v1021_v38 = vmul.f32 %v1502_v24, %v1020_v35 }
 0xde9   :  { %1411 = vmatpush.msk.msrb.mxu0 %vm221_vm2, %v1043_v36  ;;  %vm1117_vm2 = vcmask 1043456  }
 0xdea   :  { %v1025_v40 = vsel %vm1024_vm14, %v1502_v24, %v1021_v38  ;;  %1414 = vmatpush.msk.msrb.mxu2 %vm1117_vm2, %v1110_v49  ;;  %1417 = vmatpush.msk.msrb.mxu1 %vm1117_vm2, %v1187_v16 }
 0xdeb   :  { %v1036_v41 = vmul.f32 %v1025_v40, %v1002_v7 }
 0xdec   :  { %1133 = vmatpush.msrb.mxu2 %v1109_v50  ;;  %v1170_v0 = vpop.permute.xlu1 %1169 }
 0xded   :  { %v1039_v42 = vmul.f32 %v1038_v28, %v1036_v41  ;;  %v1452_v28 = vld [vmem:[%s2107_s13 + $0x3] ss:$0 sm:$0xff] }
 0xdee   :  { %1134 = vmatpush.msrb.mxu2 %v1108_v51 }
 0xdef   :  { %v1042_v27 = vadd.f32 %v1041_v32, %v1039_v42 }
 0xdf0   :  { %1135 = vmatpush.msrb.mxu2 %v1107_v53 }
 0xdf1   :  { %1071 = vmatpush.msrb.mxu0 %v1042_v27 }
 0xdf2   :  { %1412 = vmatmul.msk.f32.vlgmr.msrb.gmra.mxu0 %vm203_vm6, %v1049_v45  ;;  %1136 = vmatpush.msrb.mxu2 %v1106_v54  ;;  %vm1113_vm6 = vcmask 293888  }
 0xdf3   :  { %1163 = vmatpush.msra.mxu0 %v1143_v44 }
 0xdf4   :  { %1248 = vmatpush.msra.mxu2 %v1440_v48  ;;  %v1294_v18 = vpop.permute.xlu1 %1293 }
 0xdf5   :  { %1164 = vmatpush.msra.mxu0 %v1142_v46  ;;  %1423 = vpush %v1294_v18 }
 0xdf6   :  { %1249 = vmatpush.msra.mxu2 %v1441_v15 }
 0xdf7   :  { %1420 = vmatpush.xpose.msk.msrb.mxu0 %vm107_vm1, %v1043_v36 }
 0xdfb   :  { %1421 = vmatpush.xpose.msk.msrb.mxu0 %vm107_vm1, %v1042_v27 }
 0xe26   :  { %s1424_s25 = spop %1423 }
 0xe27   :  { %v1296_v34 = vstv %s1424_s25 }
 0xe6f   :  { %v1073_v52 = vpop.f32.mrf.mxu0 }
 0xe70   :  { %1413 = vmatmul.msk.f32.vlgmr.msra.gmra.mxu1 %vm107_vm1, %v1073_v52 }
 0xeed   :  { %v1097_v56 = vpop.f32.mrf.mxu1 }
 0xeee   :  { %v2059_v58 = vadd.f32 %v1449_v55, %v1097_v56 }
 0xef0   :  { %v1105_v59 = vsel %vm107_vm1, %v2059_v58, %v1103_v57  ;;  %v1217_v24 = vrot.slane %v2059_v58, 2 }
 0xef1   :  { %1415 = vmatmul.msk.f32.vlgmr.msrb.gmra.mxu2 %vm1113_vm6, %v1105_v59 }
 0xf74   :  { %v1138_v60 = vpop.f32.mrf.mxu2 }
 0xf75   :  { %v1139_v61 = vadd.f32 %v1450_v37, %v1138_v60 }
 0xf77   :  { %v1141_v43 = vmax.f32 %v1139_v61, 0.0 }
 0xf79   :  { %1416 = vmatmul.msk.f32.vlgmr.msra.gmra.mxu0 %vm53_vm0, %v1141_v43  ;;  %vm1188_vm0 = vcmask 31744  }
 0xf81   :  { %1422 = vmatmul.msk.f32.vlgmr.msrb.gmra.mxu0 %vm107_vm1, %v1186_v4 }
 0xff6   :  { %v1166_v63 = vpop.f32.mrf.mxu0 }
 0xff7   :  { %v1167_v1 = vadd.f32 %v1451_v62, %v1166_v63 }
 0xff9   :  { %v1172_v2 = vadd.f32 %v1170_v0, %v1167_v1 }
 0xffb   :  { %v1174_v3 = vsel %vm1173_vm8, %v1172_v2, -inf }
 0xffc   :  { %1175 = vmax.xlane.f32.xlu2 %v1174_v3 }
 0xffe   :  { %v1282_v11 = vpop.f32.mrf.mxu0 }
 0xfff   :  { %v1286_v12 = vrot.slane %v1282_v11, 7 }
0x1001   :  { %1287 = vrot.lane.b32.xlu0 %v1286_v12, %s1515_s21 }
0x106f   :  { %v1176_v5 = vpop.xlane.xlu2 %1175 }
0x1070   :  { %v1177_v6 = vsub.f32 %v1172_v2, %v1176_v5 }
0x1072   :  { %v1178_v7 = vmul.f32 1.442695, %v1177_v6 }
0x1073   :  { %v1288_v32 = vpop.permute.xlu0 %1287 }
0x1074   :  { %1503 = vpow2.f32 %v1178_v7  ;;  %v1291_v33 = vsel %vm1290_vm9, %v1282_v11, %v1288_v32 }
0x1075   :  { %v1298_v35 = vadd.f32 %v1296_v34, %v1291_v33 }
0x107a   :  { %v1504_v9 = vpop.eup %1503 }
0x107b   :  { %v1180_v39 = vsel %vm1173_vm8, %v1504_v9, 0.0 }
0x107c   :  { %1181 = vadd.xlane.f32.xlu2 %v1180_v39 }
0x1094   :  { %1443 = vrot.lane.b32.xlu2 %v1442_v10, %s1507_s23 }
0x10ef   :  { %v1182_v19 = vpop.xlane.xlu2 %1181 }
0x10f0   :  { %1505 = vrcp.f32 %v1182_v19 }
0x10f6   :  { %v1506_v20 = vpop.eup %1505 }
0x10f7   :  { %v1444_v21 = vpop.permute.xlu2 %1443  ;;  %v1184_v22 = vmul.f32 %v1506_v20, %v1504_v9 }
0x10f8   :  { %v1446_v14 = vunpack.i.h.bf16 %v1444_v21  ;;  %v1445_v23 = vunpack.i.l.bf16 %v1444_v21 }
0x10f9   :  { %1305 = vrot.lane.b32.xlu0 %v1184_v22, %s1509_s1  ;;  %1418 = vmatmul.msk.f32.vlgmr.msrb.gmra.mxu1 %vm1188_vm0, %v1184_v22  ;;  %s1517_s1 = smov 36  }
0x10fa   :  { %1250 = vmatpush.msra.mxu2 %v1445_v23 }
0x10fc   :  { %1251 = vmatpush.msra.mxu2 %v1446_v14 }
0x10fd   :  { %1419 = vmatmul.msk.f32.vlgmr.msra.gmra.mxu2 %vm107_vm1, %v1217_v24 }
0x116b   :  { %v1306_v40 = vpop.permute.xlu0 %1305 }
0x116c   :  { %v1316_v42 = vsel %vm107_vm1, %v2059_v58, %v1306_v40 }
0x1176   :  { %v1212_v26 = vpop.f32.mrf.mxu1 }
0x1177   :  { %1301 = vperm.xlu1 %1447, %v1212_v26  }
0x1180   :  { %v1253_v29 = vpop.f32.mrf.mxu2 }
0x1181   :  { %v1254_v30 = vadd.f32 %v1452_v28, %v1253_v29 }
0x1183   :  { %v1256_v31 = vadd.f32 %v1254_v30, %v1212_v26 }
0x1185   :  { %1309 = vrot.lane.b32.xlu1 %v1256_v31, %s1517_s1 }
0x11e9   :  { %v1302_v36 = vpop.permute.xlu1 %1301 }
0x11ea   :  { %v1304_v38 = vadd.f32 %v1302_v36, %v1298_v35 }
0x11ec   :  { %1313 = vrot.lane.b32.xlu0 %v1304_v38, %s1518_s26 }
0x11f7   :  { %v1310_v41 = vpop.permute.xlu1 %1309 }
0x11f8   :  { %v1317_v27 = vsel %vm1113_vm6, %v1316_v42, %v1310_v41 }
0x125e   :  { %v1314_v45 = vpop.permute.xlu0 %1313 }
0x125f   :  { %v1319_v44 = vsel %vm1318_vm15, %v1317_v27, %v1314_v45 }
0x1260   :  { %v1321_v46 = vsel %vm1320_vm3, %v1319_v44, 0.0 }
0x1261   :  { %1322 = vst [vmem:[%s2110_s14] sm:$0x3] %v1321_v46 }

</bundles_post_ra>
